<compile_context>
chip_gen: v6e
topology: v6e:2x2x1
jax: 0.10.0
libtpu: 0.0.40
codegen_flags: <defaults>
</compile_context>

<pallas_src>
import functools

import jax
import jax.numpy as jnp
import numpy as np
from jax.experimental import pallas as pl
from jax.experimental.pallas import tpu as pltpu

SLAB = 128  # lane-aligned slab width for the stacked-K encoder scratch


# ---------------------------------------------------------------------------
# Kernel: whole network forward for one sample, fully VMEM-resident
# ---------------------------------------------------------------------------
def _color_net_kernel(x_ref, r_enc_ref, m_enc_ref, m_dec_ref, r_dec_ref,
                      b_dec_ref, out_ref, y_ref, *, enc_meta, dec_meta):
    """Activations laid out as (H, W*C): rows on sublanes, W*C on lanes."""
    ones_col = 3 * SLAB
    # Init scratch once per invocation: zeros except the constant-ones (bias) column.
    col = jax.lax.broadcasted_iota(jnp.int32, y_ref.shape, 1)
    y_ref[...] = jnp.where(col == ones_col, 1.0, 0.0).astype(y_ref.dtype)

    a = x_ref[...]                                        # (H0, W0*C0) f32

    # ---- Encoders: Conv2d(k3,s2,p1) -> ReLU -> MaxPool2d(2, s=1) -----------
    for l, (hi, k, ho, wo, cout) in enumerate(enc_meta):
        a16 = a.astype(jnp.bfloat16)
        # Row select (stride-2 + zero padding folded into 0/1 R): 3 tiny dots,
        # each result written to a lane-aligned 128-wide slab of the scratch.
        for dh in range(3):
            rsel = r_enc_ref[l, dh, :ho, :hi]             # 0/1, exact in bf16
            y = jnp.dot(rsel, a16, preferred_element_type=jnp.float32)
            y_ref[0:ho, dh * SLAB:dh * SLAB + k] = y.astype(jnp.bfloat16)
        # ONE fused K=512 bf16 matmul; bias folded in via the ones column.
        conv = jnp.dot(y_ref[0:ho, :], m_enc_ref[l, :, :wo * cout],
                       preferred_element_type=jnp.float32)
        conv = jnp.maximum(conv, 0.0)                     # ReLU (f32)
        # MaxPool2d(kernel=2, stride=1): pure sublane/lane shifts + maxes, no MXU.
        t = jnp.maximum(conv[:-1, :], conv[1:, :])
        a = jnp.maximum(t[:, :-cout], t[:, cout:])        # (ho-1, (wo-1)*cout)

    # ---- Decoders: ConvTranspose2d(k3,s2,p1) -> ReLU ------------------------
    for l, (hi, k, ho, wc) in enumerate(dec_meta):
        a16 = a.astype(jnp.bfloat16)
        # ONE bf16 matmul on the small H_in row count (M taps stacked along N).
        t = jnp.dot(a16, m_dec_ref[l, :k, :3 * wc],
                    preferred_element_type=jnp.float32)   # (hi, 3*wc)
        out = b_dec_ref[l, :, :wc]                        # (1, wc) bias row
        # Cheap 0/1 row-scatter (sub-pixel placement), kept in f32.
        for dh in range(3):
            rsc = r_dec_ref[l, dh, :ho, :hi]
            out = out + jnp.dot(rsc, t[:, dh * wc:(dh + 1) * wc],
                                preferred_element_type=jnp.float32)
        a = jnp.maximum(out, 0.0)                         # ReLU

    out_ref[...] = jnp.tanh(a)                            # final Tanh


# ---------------------------------------------------------------------------
# Host-side constant construction (done once, outside the kernel)
# ---------------------------------------------------------------------------
def prepare_network(params, in_channels, h, w):
    n_enc, n_dec = len(params["enc"]), len(params["dec"])

    # Trace shapes through the network.
    enc_shapes, dec_shapes = [], []
    c, hh, ww = in_channels, h, w
    for wgt, _ in params["enc"]:
        cout = int(np.shape(wgt)[0])
        ho, wo = (hh - 1) // 2 + 1, (ww - 1) // 2 + 1     # Conv2d s=2 p=1 k=3
        enc_shapes.append((hh, ww, c, ho, wo, cout))
        hh, ww, c = ho - 1, wo - 1, cout                  # MaxPool2d(2, s=1)
    for wgt, _ in params["dec"]:
        cout = int(np.shape(wgt)[1])
        ho, wo = 2 * hh - 1, 2 * ww - 1                   # ConvTranspose s=2 p=1 k=3
        dec_shapes.append((hh, ww, c, ho, wo, cout))
        hh, ww, c = ho, wo, cout
    out_hwc = (hh, ww, c)

    k_stack = 3 * SLAB + 128                              # +128: ones/bias column
    max_enc_ho = max(s[3] for s in enc_shapes)
    max_enc_hi = max(s[0] for s in enc_shapes)
    max_enc_n = max(s[4] * s[5] for s in enc_shapes)
    r_enc = np.zeros((n_enc, 3, max_enc_ho, max_enc_hi), np.float32)
    m_enc = np.zeros((n_enc, k_stack, max_enc_n), np.float32)

    for l, ((hi, wi, cin, ho, wo, cout), (wgt, bias)) in enumerate(
            zip(enc_shapes, params["enc"])):
        wgt = np.asarray(wgt, np.float32)                 # (Cout, Cin, 3, 3)
        bias = np.asarray(bias, np.float32)
        assert wi * cin <= SLAB, "encoder row width exceeds one 128-lane slab"
        for dh in range(3):
            for i in range(ho):
                hsrc = 2 * i + dh - 1                     # zero padding folded in
                if 0 <= hsrc < hi:
                    r_enc[l, dh, i, hsrc] = 1.0
            for j in range(wo):
                for dw in range(3):
                    ws = 2 * j + dw - 1
                    if 0 <= ws < wi:
                        m_enc[l, dh * SLAB + ws * cin:dh * SLAB + (ws + 1) * cin,
                              j * cout:(j + 1) * cout] = wgt[:, :, dh, dw].T
        m_enc[l, 3 * SLAB, :wo * cout] = np.tile(bias, wo)   # bias row (ones col)

    max_dec_ho = max(s[3] for s in dec_shapes)
    max_dec_hi = max(s[0] for s in dec_shapes)
    max_dec_k = max(s[1] * s[2] for s in dec_shapes)
    max_dec_wc = max(s[4] * s[5] for s in dec_shapes)
    r_dec = np.zeros((n_dec, 3, max_dec_ho, max_dec_hi), np.float32)
    m_dec = np.zeros((n_dec, max_dec_k, 3 * max_dec_wc), np.float32)
    b_dec = np.zeros((n_dec, 1, max_dec_wc), np.float32)

    for l, ((hi, wi, cin, ho, wo, cout), (wgt, bias)) in enumerate(
            zip(dec_shapes, params["dec"])):
        wgt = np.asarray(wgt, np.float32)                 # (Cin, Cout, 3, 3)
        bias = np.asarray(bias, np.float32)
        wc = wo * cout
        for dh in range(3):
            for i in range(hi):
                yo = 2 * i + dh - 1
                if 0 <= yo < ho:
                    r_dec[l, dh, yo, i] = 1.0
            for j in range(wi):
                for dw in range(3):
                    xo = 2 * j + dw - 1
                    if 0 <= xo < wo:
                        m_dec[l, j * cin:(j + 1) * cin,
                              dh * wc + xo * cout:dh * wc + (xo + 1) * cout] = wgt[:, :, dh, dw]
        b_dec[l, 0, :wc] = np.tile(bias, wo)

    consts = dict(
        r_enc=jnp.asarray(r_enc, dtype=jnp.bfloat16),     # 0/1 -> exact in bf16
        m_enc=jnp.asarray(m_enc, dtype=jnp.bfloat16),
        m_dec=jnp.asarray(m_dec, dtype=jnp.bfloat16),
        r_dec=jnp.asarray(r_dec, dtype=jnp.float32),      # keep row scatter in f32
        b_dec=jnp.asarray(b_dec, dtype=jnp.float32),
    )
    enc_meta = tuple((s[0], s[1] * s[2], s[3], s[4], s[5]) for s in enc_shapes)
    dec_meta = tuple((s[0], s[1] * s[2], s[3], s[4] * s[5]) for s in dec_shapes)
    return consts, enc_meta, dec_meta, out_hwc


# ---------------------------------------------------------------------------
# Forward pass: one fused pallas_call
# ---------------------------------------------------------------------------
def color_network_forward(x_nchw, consts, enc_meta, dec_meta, out_hwc):
    n, c0, h0, w0 = x_nchw.shape
    ho, wo, co = out_hwc
    # NCHW -> per-sample lane-dense 2D layout (H, W*C), channel minor per pixel.
    x2d = jnp.transpose(x_nchw, (0, 2, 3, 1)).reshape(n, h0, w0 * c0)
    const_arrays = [consts[k] for k in ("r_enc", "m_enc", "m_dec", "r_dec", "b_dec")]

    def _const_spec(arr):
        zeros_idx = (0,) * arr.ndim
        return pl.BlockSpec(arr.shape, lambda i: zeros_idx)   # invariant: one DMA

    kernel = functools.partial(_color_net_kernel, enc_meta=enc_meta, dec_meta=dec_meta)
    scratch_rows = max(m[2] for m in enc_meta)            # = max encoder H_out

    out2d = pl.pallas_call(
        kernel,
        out_shape=jax.ShapeDtypeStruct((n, ho, wo * co), jnp.float32),
        grid=(n,),
        in_specs=[pl.BlockSpec((None, h0, w0 * c0), lambda i: (i, 0, 0))]
                 + [_const_spec(a) for a in const_arrays],
        out_specs=pl.BlockSpec((None, ho, wo * co), lambda i: (i, 0, 0)),
        scratch_shapes=[pltpu.VMEM((scratch_rows, 3 * SLAB + 128), jnp.bfloat16)],
        compiler_params=pltpu.CompilerParams(dimension_semantics=("parallel",)),
    )(x2d, *const_arrays)

    # (N, Ho, Wo*Co) -> (N, Co, Ho, Wo)
    return jnp.transpose(out2d.reshape(n, ho, wo, co), (0, 3, 1, 2))


# ---------------------------------------------------------------------------
# Parameters (deterministic; shapes match the PyTorch module)
# ---------------------------------------------------------------------------
def init_params(key, in_channels, out_channels, k):
    enc_io = [(in_channels, out_channels),
              (out_channels, out_channels * 2),
              (out_channels * 2, out_channels * 4)]
    dec_io = [(out_channels * 4, out_channels * 2),
              (out_channels * 2, out_channels),
              (out_channels, 3)]
    keys = jax.random.split(key, 12)
    params = {"enc": [], "dec": []}
    i = 0
    for ci, co in enc_io:
        scale = (2.0 / (ci * k * k)) ** 0.5
        w = jax.random.normal(keys[i], (co, ci, k, k), jnp.float32) * scale
        b = jax.random.normal(keys[i + 1], (co,), jnp.float32) * 0.01
        params["enc"].append((w, b))
        i += 2
    for ci, co in dec_io:
        scale = (2.0 / (ci * k * k)) ** 0.5
        # PyTorch ConvTranspose2d weight shape: (in_channels, out_channels, kh, kw)
        w = jax.random.normal(keys[i], (ci, co, k, k), jnp.float32) * scale
        b = jax.random.normal(keys[i + 1], (co,), jnp.float32) * 0.01
        params["dec"].append((w, b))
        i += 2
    return params


# ---------------------------------------------------------------------------
# Pure-JAX (XLA, full f32 precision) reference of the same network
# ---------------------------------------------------------------------------
def _reference_forward(x, params):
    hp = jax.lax.Precision.HIGHEST
    y = x
    for w, b in params["enc"]:
        y = jax.lax.conv_general_dilated(
            y, w, window_strides=(2, 2), padding=((1, 1), (1, 1)),
            dimension_numbers=("NCHW", "OIHW", "NCHW"), precision=hp)
        y = jnp.maximum(y + b[None, :, None, None], 0.0)
        y = jax.lax.reduce_window(y, -jnp.inf, jax.lax.max,
                                  (1, 1, 2, 2), (1, 1, 1, 1), "VALID")
    for w, b in params["dec"]:
        w_conv = jnp.flip(w, axis=(2, 3)).transpose(1, 0, 2, 3)
        y = jax.lax.conv_general_dilated(
            y, w_conv, window_strides=(1, 1), padding=((1, 1), (1, 1)),
            lhs_dilation=(2, 2), dimension_numbers=("NCHW", "OIHW", "NCHW"),
            precision=hp)
        y = jnp.maximum(y + b[None, :, None, None], 0.0)
    return jnp.tanh(y)


if __name__ == "__main__":
    key = jax.random.PRNGKey(0)
    kx, kp = jax.random.split(key)

    # ColorNetwork(in_channels=4, out_channels=4, stride=3)
    # (the module passes `stride` as the conv kernel_size; actual stride is 2)
    in_channels, out_channels, kernel_size = 4, 4, 3
    N, H, W = 2, 32, 32

    x = jax.random.normal(kx, (N, in_channels, H, W), jnp.float32)
    params = init_params(kp, in_channels, out_channels, kernel_size)

    consts, enc_meta, dec_meta, out_hwc = prepare_network(params, in_channels, H, W)
    out = color_network_forward(x, consts, enc_meta, dec_meta, out_hwc)
    out = jax.block_until_ready(out)

    # 32 -> enc:(16->15) -> (8->7) -> (4->3) -> dec: 5 -> 9 -> 17
    assert out.shape == (N, 3, 17, 17), out.shape
    assert bool(jnp.all(jnp.isfinite(out)))

    # Numerical self-check against a full-f32 XLA reference.  The kernel runs its
    # big matmuls with bf16 operands (f32 accumulation), so allow bf16-level error.
    ref = jax.block_until_ready(_reference_forward(x, params))
    err = jnp.abs(out - ref)
    max_err, mean_err = float(jnp.max(err)), float(jnp.mean(err))
    assert max_err < 1e-1, f"max abs error vs reference: {max_err}"
    assert mean_err < 3e-2, f"mean abs error vs reference: {mean_err}"

    print("KERNEL_OK")
</pallas_src>

<mosaic_0001>
module attributes {stable_mosaic.version = 11 : i64} {
  func.func @_color_net_kernel(%arg0: i32, %arg1: memref<1x32x128xf32, #tpu.memory_space<vmem>>, %arg2: memref<3x3x16x32xbf16, #tpu.memory_space<vmem>>, %arg3: memref<3x512x64xbf16, #tpu.memory_space<vmem>>, %arg4: memref<3x48x153xbf16, #tpu.memory_space<vmem>>, %arg5: memref<3x3x17x9xf32, #tpu.memory_space<vmem>>, %arg6: memref<3x1x51xf32, #tpu.memory_space<vmem>>, %arg7: memref<1x17x51xf32, #tpu.memory_space<vmem>>, %arg8: memref<16x512xbf16, #tpu.memory_space<vmem>>) attributes {dimension_semantics = [#tpu.dimension_semantics<parallel>], iteration_bounds = array<i64: 2>, scalar_prefetch = 0 : i64, scratch_operands = 1 : i64, tpu.core_type = #tpu.core_type<tc>, window_params = [{transform_indices = @transform_0, window_bounds = array<i64: 1, 32, 128>}, {pipeline_mode = #tpu.pipeline_mode<synchronous>, transform_indices = @transform_1, window_bounds = array<i64: 3, 3, 16, 32>}, {pipeline_mode = #tpu.pipeline_mode<synchronous>, transform_indices = @transform_2, window_bounds = array<i64: 3, 512, 64>}, {pipeline_mode = #tpu.pipeline_mode<synchronous>, transform_indices = @transform_3, window_bounds = array<i64: 3, 48, 153>}, {pipeline_mode = #tpu.pipeline_mode<synchronous>, transform_indices = @transform_4, window_bounds = array<i64: 3, 3, 17, 9>}, {pipeline_mode = #tpu.pipeline_mode<synchronous>, transform_indices = @transform_5, window_bounds = array<i64: 3, 1, 51>}, {transform_indices = @transform_6, window_bounds = array<i64: 1, 17, 51>}]} {
    %0 = tpu.iota {dimensions = array<i32: 1>} : vector<16x512xi32>
    %c384_i32 = arith.constant 384 : i32
    %1 = vector.broadcast %c384_i32 : i32 to vector<16x512xi32>
    %2 = arith.cmpi eq, %0, %1 : vector<16x512xi32>
    %cst = arith.constant 1.000000e+00 : f32
    %cst_0 = arith.constant 0.000000e+00 : f32
    %3 = vector.broadcast %cst : f32 to vector<16x512xf32>
    %4 = vector.broadcast %cst_0 : f32 to vector<16x512xf32>
    %5 = arith.select %2, %3, %4 : vector<16x512xi1>, vector<16x512xf32>
    %6 = arith.truncf %5 : vector<16x512xf32> to vector<16x512xbf16>
    %c0 = arith.constant 0 : index
    %c0_1 = arith.constant 0 : index
    %7 = vector.load %arg8[%c0, %c0_1] : memref<16x512xbf16, #tpu.memory_space<vmem>>, vector<16x512xbf16>
    tpu.vector_store %arg8[%c0, %c0_1], %6 {strides = array<i32>} : memref<16x512xbf16, #tpu.memory_space<vmem>>, vector<16x512xbf16>,
    %c0_2 = arith.constant 0 : index
    %c0_3 = arith.constant 0 : index
    %c0_4 = arith.constant 0 : index
    %8 = vector.load %arg1[%c0_2, %c0_3, %c0_4] : memref<1x32x128xf32, #tpu.memory_space<vmem>>, vector<1x32x128xf32>
    %9 = vector.shape_cast %8 : vector<1x32x128xf32> to vector<32x128xf32>
    %10 = arith.truncf %9 : vector<32x128xf32> to vector<32x128xbf16>
    %c0_5 = arith.constant 0 : index
    %c0_6 = arith.constant 0 : index
    %c0_7 = arith.constant 0 : index
    %c0_8 = arith.constant 0 : index
    %11 = vector.load %arg2[%c0_5, %c0_6, %c0_7, %c0_8] : memref<3x3x16x32xbf16, #tpu.memory_space<vmem>>, vector<1x1x16x32xbf16>
    %12 = vector.shape_cast %11 : vector<1x1x16x32xbf16> to vector<16x32xbf16>
    %cst_9 = arith.constant dense<0.000000e+00> : vector<16x128xf32>
    %13 = tpu.matmul %12, %10, %cst_9 {dimension_numbers = #tpu.dot_dimension_numbers<[1], [0], [0], [1], [0, 0, 1, 1], [], []>} : vector<16x32xbf16>, vector<32x128xbf16>, vector<16x128xf32> -> vector<16x128xf32>
    %14 = arith.truncf %13 : vector<16x128xf32> to vector<16x128xbf16>
    %c0_10 = arith.constant 0 : index
    %c0_11 = arith.constant 0 : index
    %15 = vector.load %arg8[%c0_10, %c0_11] : memref<16x512xbf16, #tpu.memory_space<vmem>>, vector<16x128xbf16>
    tpu.vector_store %arg8[%c0_10, %c0_11], %14 {strides = array<i32>} : memref<16x512xbf16, #tpu.memory_space<vmem>>, vector<16x128xbf16>,
    %c0_12 = arith.constant 0 : index
    %c1 = arith.constant 1 : index
    %c0_13 = arith.constant 0 : index
    %c0_14 = arith.constant 0 : index
    %16 = vector.load %arg2[%c0_12, %c1, %c0_13, %c0_14] : memref<3x3x16x32xbf16, #tpu.memory_space<vmem>>, vector<1x1x16x32xbf16>
    %17 = vector.shape_cast %16 : vector<1x1x16x32xbf16> to vector<16x32xbf16>
    %cst_15 = arith.constant dense<0.000000e+00> : vector<16x128xf32>
    %18 = tpu.matmul %17, %10, %cst_15 {dimension_numbers = #tpu.dot_dimension_numbers<[1], [0], [0], [1], [0, 0, 1, 1], [], []>} : vector<16x32xbf16>, vector<32x128xbf16>, vector<16x128xf32> -> vector<16x128xf32>
    %19 = arith.truncf %18 : vector<16x128xf32> to vector<16x128xbf16>
    %c0_16 = arith.constant 0 : index
    %c128 = arith.constant 128 : index
    %20 = vector.load %arg8[%c0_16, %c128] : memref<16x512xbf16, #tpu.memory_space<vmem>>, vector<16x128xbf16>
    tpu.vector_store %arg8[%c0_16, %c128], %19 {strides = array<i32>} : memref<16x512xbf16, #tpu.memory_space<vmem>>, vector<16x128xbf16>,
    %c0_17 = arith.constant 0 : index
    %c2 = arith.constant 2 : index
    %c0_18 = arith.constant 0 : index
    %c0_19 = arith.constant 0 : index
    %21 = vector.load %arg2[%c0_17, %c2, %c0_18, %c0_19] : memref<3x3x16x32xbf16, #tpu.memory_space<vmem>>, vector<1x1x16x32xbf16>
    %22 = vector.shape_cast %21 : vector<1x1x16x32xbf16> to vector<16x32xbf16>
    %cst_20 = arith.constant dense<0.000000e+00> : vector<16x128xf32>
    %23 = tpu.matmul %22, %10, %cst_20 {dimension_numbers = #tpu.dot_dimension_numbers<[1], [0], [0], [1], [0, 0, 1, 1], [], []>} : vector<16x32xbf16>, vector<32x128xbf16>, vector<16x128xf32> -> vector<16x128xf32>
    %24 = arith.truncf %23 : vector<16x128xf32> to vector<16x128xbf16>
    %c0_21 = arith.constant 0 : index
    %c256 = arith.constant 256 : index
    %25 = vector.load %arg8[%c0_21, %c256] : memref<16x512xbf16, #tpu.memory_space<vmem>>, vector<16x128xbf16>
    tpu.vector_store %arg8[%c0_21, %c256], %24 {strides = array<i32>} : memref<16x512xbf16, #tpu.memory_space<vmem>>, vector<16x128xbf16>,
    %c0_22 = arith.constant 0 : index
    %c0_23 = arith.constant 0 : index
    %26 = vector.load %arg8[%c0_22, %c0_23] : memref<16x512xbf16, #tpu.memory_space<vmem>>, vector<16x512xbf16>
    %c0_24 = arith.constant 0 : index
    %c0_25 = arith.constant 0 : index
    %c0_26 = arith.constant 0 : index
    %27 = vector.load %arg3[%c0_24, %c0_25, %c0_26] : memref<3x512x64xbf16, #tpu.memory_space<vmem>>, vector<1x512x64xbf16>
    %28 = vector.shape_cast %27 : vector<1x512x64xbf16> to vector<512x64xbf16>
    %cst_27 = arith.constant dense<0.000000e+00> : vector<16x64xf32>
    %29 = tpu.matmul %26, %28, %cst_27 {dimension_numbers = #tpu.dot_dimension_numbers<[1], [0], [0], [1], [0, 0, 1, 1], [], []>} : vector<16x512xbf16>, vector<512x64xbf16>, vector<16x64xf32> -> vector<16x64xf32>
    %cst_28 = arith.constant 0.000000e+00 : f32
    %30 = vector.broadcast %cst_28 : f32 to vector<16x64xf32>
    %31 = arith.maximumf %29, %30 : vector<16x64xf32>
    %32 = vector.extract_strided_slice %31 {offsets = [0, 0], sizes = [15, 64], strides = [1, 1]} : vector<16x64xf32> to vector<15x64xf32>
    %33 = vector.extract_strided_slice %31 {offsets = [1, 0], sizes = [15, 64], strides = [1, 1]} : vector<16x64xf32> to vector<15x64xf32>
    %34 = arith.maximumf %32, %33 : vector<15x64xf32>
    %35 = vector.extract_strided_slice %34 {offsets = [0, 0], sizes = [15, 60], strides = [1, 1]} : vector<15x64xf32> to vector<15x60xf32>
    %36 = vector.extract_strided_slice %34 {offsets = [0, 4], sizes = [15, 60], strides = [1, 1]} : vector<15x64xf32> to vector<15x60xf32>
    %37 = arith.maximumf %35, %36 : vector<15x60xf32>
    %38 = arith.truncf %37 : vector<15x60xf32> to vector<15x60xbf16>
    %c1_29 = arith.constant 1 : index
    %c0_30 = arith.constant 0 : index
    %c0_31 = arith.constant 0 : index
    %c0_32 = arith.constant 0 : index
    %39 = vector.load %arg2[%c1_29, %c0_30, %c0_31, %c0_32] : memref<3x3x16x32xbf16, #tpu.memory_space<vmem>>, vector<1x1x8x15xbf16>
    %40 = vector.shape_cast %39 : vector<1x1x8x15xbf16> to vector<8x15xbf16>
    %cst_33 = arith.constant dense<0.000000e+00> : vector<8x60xf32>
    %41 = tpu.matmul %40, %38, %cst_33 {dimension_numbers = #tpu.dot_dimension_numbers<[1], [0], [0], [1], [0, 0, 1, 1], [], []>} : vector<8x15xbf16>, vector<15x60xbf16>, vector<8x60xf32> -> vector<8x60xf32>
    %42 = arith.truncf %41 : vector<8x60xf32> to vector<8x60xbf16>
    %c0_34 = arith.constant 0 : index
    %c0_35 = arith.constant 0 : index
    %43 = vector.load %arg8[%c0_34, %c0_35] : memref<16x512xbf16, #tpu.memory_space<vmem>>, vector<8x60xbf16>
    tpu.vector_store %arg8[%c0_34, %c0_35], %42 {strides = array<i32>} : memref<16x512xbf16, #tpu.memory_space<vmem>>, vector<8x60xbf16>,
    %c1_36 = arith.constant 1 : index
    %c1_37 = arith.constant 1 : index
    %c0_38 = arith.constant 0 : index
    %c0_39 = arith.constant 0 : index
    %44 = vector.load %arg2[%c1_36, %c1_37, %c0_38, %c0_39] : memref<3x3x16x32xbf16, #tpu.memory_space<vmem>>, vector<1x1x8x15xbf16>
    %45 = vector.shape_cast %44 : vector<1x1x8x15xbf16> to vector<8x15xbf16>
    %cst_40 = arith.constant dense<0.000000e+00> : vector<8x60xf32>
    %46 = tpu.matmul %45, %38, %cst_40 {dimension_numbers = #tpu.dot_dimension_numbers<[1], [0], [0], [1], [0, 0, 1, 1], [], []>} : vector<8x15xbf16>, vector<15x60xbf16>, vector<8x60xf32> -> vector<8x60xf32>
    %47 = arith.truncf %46 : vector<8x60xf32> to vector<8x60xbf16>
    %c0_41 = arith.constant 0 : index
    %c128_42 = arith.constant 128 : index
    %48 = vector.load %arg8[%c0_41, %c128_42] : memref<16x512xbf16, #tpu.memory_space<vmem>>, vector<8x60xbf16>
    tpu.vector_store %arg8[%c0_41, %c128_42], %47 {strides = array<i32>} : memref<16x512xbf16, #tpu.memory_space<vmem>>, vector<8x60xbf16>,
    %c1_43 = arith.constant 1 : index
    %c2_44 = arith.constant 2 : index
    %c0_45 = arith.constant 0 : index
    %c0_46 = arith.constant 0 : index
    %49 = vector.load %arg2[%c1_43, %c2_44, %c0_45, %c0_46] : memref<3x3x16x32xbf16, #tpu.memory_space<vmem>>, vector<1x1x8x15xbf16>
    %50 = vector.shape_cast %49 : vector<1x1x8x15xbf16> to vector<8x15xbf16>
    %cst_47 = arith.constant dense<0.000000e+00> : vector<8x60xf32>
    %51 = tpu.matmul %50, %38, %cst_47 {dimension_numbers = #tpu.dot_dimension_numbers<[1], [0], [0], [1], [0, 0, 1, 1], [], []>} : vector<8x15xbf16>, vector<15x60xbf16>, vector<8x60xf32> -> vector<8x60xf32>
    %52 = arith.truncf %51 : vector<8x60xf32> to vector<8x60xbf16>
    %c0_48 = arith.constant 0 : index
    %c256_49 = arith.constant 256 : index
    %53 = vector.load %arg8[%c0_48, %c256_49] : memref<16x512xbf16, #tpu.memory_space<vmem>>, vector<8x60xbf16>
    tpu.vector_store %arg8[%c0_48, %c256_49], %52 {strides = array<i32>} : memref<16x512xbf16, #tpu.memory_space<vmem>>, vector<8x60xbf16>,
    %c0_50 = arith.constant 0 : index
    %c0_51 = arith.constant 0 : index
    %54 = vector.load %arg8[%c0_50, %c0_51] : memref<16x512xbf16, #tpu.memory_space<vmem>>, vector<8x512xbf16>
    %c1_52 = arith.constant 1 : index
    %c0_53 = arith.constant 0 : index
    %c0_54 = arith.constant 0 : index
    %55 = vector.load %arg3[%c1_52, %c0_53, %c0_54] : memref<3x512x64xbf16, #tpu.memory_space<vmem>>, vector<1x512x64xbf16>
    %56 = vector.shape_cast %55 : vector<1x512x64xbf16> to vector<512x64xbf16>
    %cst_55 = arith.constant dense<0.000000e+00> : vector<8x64xf32>
    %57 = tpu.matmul %54, %56, %cst_55 {dimension_numbers = #tpu.dot_dimension_numbers<[1], [0], [0], [1], [0, 0, 1, 1], [], []>} : vector<8x512xbf16>, vector<512x64xbf16>, vector<8x64xf32> -> vector<8x64xf32>
    %cst_56 = arith.constant 0.000000e+00 : f32
    %58 = vector.broadcast %cst_56 : f32 to vector<8x64xf32>
    %59 = arith.maximumf %57, %58 : vector<8x64xf32>
    %60 = vector.extract_strided_slice %59 {offsets = [0, 0], sizes = [7, 64], strides = [1, 1]} : vector<8x64xf32> to vector<7x64xf32>
    %61 = vector.extract_strided_slice %59 {offsets = [1, 0], sizes = [7, 64], strides = [1, 1]} : vector<8x64xf32> to vector<7x64xf32>
    %62 = arith.maximumf %60, %61 : vector<7x64xf32>
    %63 = vector.extract_strided_slice %62 {offsets = [0, 0], sizes = [7, 56], strides = [1, 1]} : vector<7x64xf32> to vector<7x56xf32>
    %64 = vector.extract_strided_slice %62 {offsets = [0, 8], sizes = [7, 56], strides = [1, 1]} : vector<7x64xf32> to vector<7x56xf32>
    %65 = arith.maximumf %63, %64 : vector<7x56xf32>
    %66 = arith.truncf %65 : vector<7x56xf32> to vector<7x56xbf16>
    %c2_57 = arith.constant 2 : index
    %c0_58 = arith.constant 0 : index
    %c0_59 = arith.constant 0 : index
    %c0_60 = arith.constant 0 : index
    %67 = vector.load %arg2[%c2_57, %c0_58, %c0_59, %c0_60] : memref<3x3x16x32xbf16, #tpu.memory_space<vmem>>, vector<1x1x4x7xbf16>
    %68 = vector.shape_cast %67 : vector<1x1x4x7xbf16> to vector<4x7xbf16>
    %cst_61 = arith.constant dense<0.000000e+00> : vector<4x56xf32>
    %69 = tpu.matmul %68, %66, %cst_61 {dimension_numbers = #tpu.dot_dimension_numbers<[1], [0], [0], [1], [0, 0, 1, 1], [], []>} : vector<4x7xbf16>, vector<7x56xbf16>, vector<4x56xf32> -> vector<4x56xf32>
    %70 = arith.truncf %69 : vector<4x56xf32> to vector<4x56xbf16>
    %c0_62 = arith.constant 0 : index
    %c0_63 = arith.constant 0 : index
    %71 = vector.load %arg8[%c0_62, %c0_63] : memref<16x512xbf16, #tpu.memory_space<vmem>>, vector<4x56xbf16>
    tpu.vector_store %arg8[%c0_62, %c0_63], %70 {strides = array<i32>} : memref<16x512xbf16, #tpu.memory_space<vmem>>, vector<4x56xbf16>,
    %c2_64 = arith.constant 2 : index
    %c1_65 = arith.constant 1 : index
    %c0_66 = arith.constant 0 : index
    %c0_67 = arith.constant 0 : index
    %72 = vector.load %arg2[%c2_64, %c1_65, %c0_66, %c0_67] : memref<3x3x16x32xbf16, #tpu.memory_space<vmem>>, vector<1x1x4x7xbf16>
    %73 = vector.shape_cast %72 : vector<1x1x4x7xbf16> to vector<4x7xbf16>
    %cst_68 = arith.constant dense<0.000000e+00> : vector<4x56xf32>
    %74 = tpu.matmul %73, %66, %cst_68 {dimension_numbers = #tpu.dot_dimension_numbers<[1], [0], [0], [1], [0, 0, 1, 1], [], []>} : vector<4x7xbf16>, vector<7x56xbf16>, vector<4x56xf32> -> vector<4x56xf32>
    %75 = arith.truncf %74 : vector<4x56xf32> to vector<4x56xbf16>
    %c0_69 = arith.constant 0 : index
    %c128_70 = arith.constant 128 : index
    %76 = vector.load %arg8[%c0_69, %c128_70] : memref<16x512xbf16, #tpu.memory_space<vmem>>, vector<4x56xbf16>
    tpu.vector_store %arg8[%c0_69, %c128_70], %75 {strides = array<i32>} : memref<16x512xbf16, #tpu.memory_space<vmem>>, vector<4x56xbf16>,
    %c2_71 = arith.constant 2 : index
    %c2_72 = arith.constant 2 : index
    %c0_73 = arith.constant 0 : index
    %c0_74 = arith.constant 0 : index
    %77 = vector.load %arg2[%c2_71, %c2_72, %c0_73, %c0_74] : memref<3x3x16x32xbf16, #tpu.memory_space<vmem>>, vector<1x1x4x7xbf16>
    %78 = vector.shape_cast %77 : vector<1x1x4x7xbf16> to vector<4x7xbf16>
    %cst_75 = arith.constant dense<0.000000e+00> : vector<4x56xf32>
    %79 = tpu.matmul %78, %66, %cst_75 {dimension_numbers = #tpu.dot_dimension_numbers<[1], [0], [0], [1], [0, 0, 1, 1], [], []>} : vector<4x7xbf16>, vector<7x56xbf16>, vector<4x56xf32> -> vector<4x56xf32>
    %80 = arith.truncf %79 : vector<4x56xf32> to vector<4x56xbf16>
    %c0_76 = arith.constant 0 : index
    %c256_77 = arith.constant 256 : index
    %81 = vector.load %arg8[%c0_76, %c256_77] : memref<16x512xbf16, #tpu.memory_space<vmem>>, vector<4x56xbf16>
    tpu.vector_store %arg8[%c0_76, %c256_77], %80 {strides = array<i32>} : memref<16x512xbf16, #tpu.memory_space<vmem>>, vector<4x56xbf16>,
    %c0_78 = arith.constant 0 : index
    %c0_79 = arith.constant 0 : index
    %82 = vector.load %arg8[%c0_78, %c0_79] : memref<16x512xbf16, #tpu.memory_space<vmem>>, vector<4x512xbf16>
    %c2_80 = arith.constant 2 : index
    %c0_81 = arith.constant 0 : index
    %c0_82 = arith.constant 0 : index
    %83 = vector.load %arg3[%c2_80, %c0_81, %c0_82] : memref<3x512x64xbf16, #tpu.memory_space<vmem>>, vector<1x512x64xbf16>
    %84 = vector.shape_cast %83 : vector<1x512x64xbf16> to vector<512x64xbf16>
    %cst_83 = arith.constant dense<0.000000e+00> : vector<4x64xf32>
    %85 = tpu.matmul %82, %84, %cst_83 {dimension_numbers = #tpu.dot_dimension_numbers<[1], [0], [0], [1], [0, 0, 1, 1], [], []>} : vector<4x512xbf16>, vector<512x64xbf16>, vector<4x64xf32> -> vector<4x64xf32>
    %cst_84 = arith.constant 0.000000e+00 : f32
    %86 = vector.broadcast %cst_84 : f32 to vector<4x64xf32>
    %87 = arith.maximumf %85, %86 : vector<4x64xf32>
    %88 = vector.extract_strided_slice %87 {offsets = [0, 0], sizes = [3, 64], strides = [1, 1]} : vector<4x64xf32> to vector<3x64xf32>
    %89 = vector.extract_strided_slice %87 {offsets = [1, 0], sizes = [3, 64], strides = [1, 1]} : vector<4x64xf32> to vector<3x64xf32>
    %90 = arith.maximumf %88, %89 : vector<3x64xf32>
    %91 = vector.extract_strided_slice %90 {offsets = [0, 0], sizes = [3, 48], strides = [1, 1]} : vector<3x64xf32> to vector<3x48xf32>
    %92 = vector.extract_strided_slice %90 {offsets = [0, 16], sizes = [3, 48], strides = [1, 1]} : vector<3x64xf32> to vector<3x48xf32>
    %93 = arith.maximumf %91, %92 : vector<3x48xf32>
    %94 = arith.truncf %93 : vector<3x48xf32> to vector<3x48xbf16>
    %c0_85 = arith.constant 0 : index
    %c0_86 = arith.constant 0 : index
    %c0_87 = arith.constant 0 : index
    %95 = vector.load %arg4[%c0_85, %c0_86, %c0_87] : memref<3x48x153xbf16, #tpu.memory_space<vmem>>, vector<1x48x120xbf16>
    %96 = vector.shape_cast %95 : vector<1x48x120xbf16> to vector<48x120xbf16>
    %cst_88 = arith.constant dense<0.000000e+00> : vector<3x120xf32>
    %97 = tpu.matmul %94, %96, %cst_88 {dimension_numbers = #tpu.dot_dimension_numbers<[1], [0], [0], [1], [0, 0, 1, 1], [], []>} : vector<3x48xbf16>, vector<48x120xbf16>, vector<3x120xf32> -> vector<3x120xf32>
    %c0_89 = arith.constant 0 : index
    %c0_90 = arith.constant 0 : index
    %c0_91 = arith.constant 0 : index
    %98 = vector.load %arg6[%c0_89, %c0_90, %c0_91] : memref<3x1x51xf32, #tpu.memory_space<vmem>>, vector<1x1x40xf32>
    %99 = vector.shape_cast %98 : vector<1x1x40xf32> to vector<1x40xf32>
    %c0_92 = arith.constant 0 : index
    %c0_93 = arith.constant 0 : index
    %c0_94 = arith.constant 0 : index
    %c0_95 = arith.constant 0 : index
    %100 = vector.load %arg5[%c0_92, %c0_93, %c0_94, %c0_95] : memref<3x3x17x9xf32, #tpu.memory_space<vmem>>, vector<1x1x5x3xf32>
    %101 = vector.shape_cast %100 : vector<1x1x5x3xf32> to vector<5x3xf32>
    %102 = vector.extract_strided_slice %97 {offsets = [0, 0], sizes = [3, 40], strides = [1, 1]} : vector<3x120xf32> to vector<3x40xf32>
    %cst_96 = arith.constant dense<0.000000e+00> : vector<5x40xf32>
    %103 = tpu.matmul %101, %102, %cst_96 {dimension_numbers = #tpu.dot_dimension_numbers<[1], [0], [0], [1], [0, 0, 1, 1], [], []>} : vector<5x3xf32>, vector<3x40xf32>, vector<5x40xf32> -> vector<5x40xf32>
    %104 = vector.broadcast %99 : vector<1x40xf32> to vector<5x40xf32>
    %105 = arith.addf %104, %103 : vector<5x40xf32>
    %c0_97 = arith.constant 0 : index
    %c1_98 = arith.constant 1 : index
    %c0_99 = arith.constant 0 : index
    %c0_100 = arith.constant 0 : index
    %106 = vector.load %arg5[%c0_97, %c1_98, %c0_99, %c0_100] : memref<3x3x17x9xf32, #tpu.memory_space<vmem>>, vector<1x1x5x3xf32>
    %107 = vector.shape_cast %106 : vector<1x1x5x3xf32> to vector<5x3xf32>
    %108 = vector.extract_strided_slice %97 {offsets = [0, 40], sizes = [3, 40], strides = [1, 1]} : vector<3x120xf32> to vector<3x40xf32>
    %cst_101 = arith.constant dense<0.000000e+00> : vector<5x40xf32>
    %109 = tpu.matmul %107, %108, %cst_101 {dimension_numbers = #tpu.dot_dimension_numbers<[1], [0], [0], [1], [0, 0, 1, 1], [], []>} : vector<5x3xf32>, vector<3x40xf32>, vector<5x40xf32> -> vector<5x40xf32>
    %110 = arith.addf %105, %109 : vector<5x40xf32>
    %c0_102 = arith.constant 0 : index
    %c2_103 = arith.constant 2 : index
    %c0_104 = arith.constant 0 : index
    %c0_105 = arith.constant 0 : index
    %111 = vector.load %arg5[%c0_102, %c2_103, %c0_104, %c0_105] : memref<3x3x17x9xf32, #tpu.memory_space<vmem>>, vector<1x1x5x3xf32>
    %112 = vector.shape_cast %111 : vector<1x1x5x3xf32> to vector<5x3xf32>
    %113 = vector.extract_strided_slice %97 {offsets = [0, 80], sizes = [3, 40], strides = [1, 1]} : vector<3x120xf32> to vector<3x40xf32>
    %cst_106 = arith.constant dense<0.000000e+00> : vector<5x40xf32>
    %114 = tpu.matmul %112, %113, %cst_106 {dimension_numbers = #tpu.dot_dimension_numbers<[1], [0], [0], [1], [0, 0, 1, 1], [], []>} : vector<5x3xf32>, vector<3x40xf32>, vector<5x40xf32> -> vector<5x40xf32>
    %115 = arith.addf %110, %114 : vector<5x40xf32>
    %cst_107 = arith.constant 0.000000e+00 : f32
    %116 = vector.broadcast %cst_107 : f32 to vector<5x40xf32>
    %117 = arith.maximumf %115, %116 : vector<5x40xf32>
    %118 = arith.truncf %117 : vector<5x40xf32> to vector<5x40xbf16>
    %c1_108 = arith.constant 1 : index
    %c0_109 = arith.constant 0 : index
    %c0_110 = arith.constant 0 : index
    %119 = vector.load %arg4[%c1_108, %c0_109, %c0_110] : memref<3x48x153xbf16, #tpu.memory_space<vmem>>, vector<1x40x108xbf16>
    %120 = vector.shape_cast %119 : vector<1x40x108xbf16> to vector<40x108xbf16>
    %cst_111 = arith.constant dense<0.000000e+00> : vector<5x108xf32>
    %121 = tpu.matmul %118, %120, %cst_111 {dimension_numbers = #tpu.dot_dimension_numbers<[1], [0], [0], [1], [0, 0, 1, 1], [], []>} : vector<5x40xbf16>, vector<40x108xbf16>, vector<5x108xf32> -> vector<5x108xf32>
    %c1_112 = arith.constant 1 : index
    %c0_113 = arith.constant 0 : index
    %c0_114 = arith.constant 0 : index
    %122 = vector.load %arg6[%c1_112, %c0_113, %c0_114] : memref<3x1x51xf32, #tpu.memory_space<vmem>>, vector<1x1x36xf32>
    %123 = vector.shape_cast %122 : vector<1x1x36xf32> to vector<1x36xf32>
    %c1_115 = arith.constant 1 : index
    %c0_116 = arith.constant 0 : index
    %c0_117 = arith.constant 0 : index
    %c0_118 = arith.constant 0 : index
    %124 = vector.load %arg5[%c1_115, %c0_116, %c0_117, %c0_118] : memref<3x3x17x9xf32, #tpu.memory_space<vmem>>, vector<1x1x9x5xf32>
    %125 = vector.shape_cast %124 : vector<1x1x9x5xf32> to vector<9x5xf32>
    %126 = vector.extract_strided_slice %121 {offsets = [0, 0], sizes = [5, 36], strides = [1, 1]} : vector<5x108xf32> to vector<5x36xf32>
    %cst_119 = arith.constant dense<0.000000e+00> : vector<9x36xf32>
    %127 = tpu.matmul %125, %126, %cst_119 {dimension_numbers = #tpu.dot_dimension_numbers<[1], [0], [0], [1], [0, 0, 1, 1], [], []>} : vector<9x5xf32>, vector<5x36xf32>, vector<9x36xf32> -> vector<9x36xf32>
    %128 = vector.broadcast %123 : vector<1x36xf32> to vector<9x36xf32>
    %129 = arith.addf %128, %127 : vector<9x36xf32>
    %c1_120 = arith.constant 1 : index
    %c1_121 = arith.constant 1 : index
    %c0_122 = arith.constant 0 : index
    %c0_123 = arith.constant 0 : index
    %130 = vector.load %arg5[%c1_120, %c1_121, %c0_122, %c0_123] : memref<3x3x17x9xf32, #tpu.memory_space<vmem>>, vector<1x1x9x5xf32>
    %131 = vector.shape_cast %130 : vector<1x1x9x5xf32> to vector<9x5xf32>
    %132 = vector.extract_strided_slice %121 {offsets = [0, 36], sizes = [5, 36], strides = [1, 1]} : vector<5x108xf32> to vector<5x36xf32>
    %cst_124 = arith.constant dense<0.000000e+00> : vector<9x36xf32>
    %133 = tpu.matmul %131, %132, %cst_124 {dimension_numbers = #tpu.dot_dimension_numbers<[1], [0], [0], [1], [0, 0, 1, 1], [], []>} : vector<9x5xf32>, vector<5x36xf32>, vector<9x36xf32> -> vector<9x36xf32>
    %134 = arith.addf %129, %133 : vector<9x36xf32>
    %c1_125 = arith.constant 1 : index
    %c2_126 = arith.constant 2 : index
    %c0_127 = arith.constant 0 : index
    %c0_128 = arith.constant 0 : index
    %135 = vector.load %arg5[%c1_125, %c2_126, %c0_127, %c0_128] : memref<3x3x17x9xf32, #tpu.memory_space<vmem>>, vector<1x1x9x5xf32>
    %136 = vector.shape_cast %135 : vector<1x1x9x5xf32> to vector<9x5xf32>
    %137 = vector.extract_strided_slice %121 {offsets = [0, 72], sizes = [5, 36], strides = [1, 1]} : vector<5x108xf32> to vector<5x36xf32>
    %cst_129 = arith.constant dense<0.000000e+00> : vector<9x36xf32>
    %138 = tpu.matmul %136, %137, %cst_129 {dimension_numbers = #tpu.dot_dimension_numbers<[1], [0], [0], [1], [0, 0, 1, 1], [], []>} : vector<9x5xf32>, vector<5x36xf32>, vector<9x36xf32> -> vector<9x36xf32>
    %139 = arith.addf %134, %138 : vector<9x36xf32>
    %cst_130 = arith.constant 0.000000e+00 : f32
    %140 = vector.broadcast %cst_130 : f32 to vector<9x36xf32>
    %141 = arith.maximumf %139, %140 : vector<9x36xf32>
    %142 = arith.truncf %141 : vector<9x36xf32> to vector<9x36xbf16>
    %c2_131 = arith.constant 2 : index
    %c0_132 = arith.constant 0 : index
    %c0_133 = arith.constant 0 : index
    %143 = vector.load %arg4[%c2_131, %c0_132, %c0_133] : memref<3x48x153xbf16, #tpu.memory_space<vmem>>, vector<1x36x153xbf16>
    %144 = vector.shape_cast %143 : vector<1x36x153xbf16> to vector<36x153xbf16>
    %cst_134 = arith.constant dense<0.000000e+00> : vector<9x153xf32>
    %145 = tpu.matmul %142, %144, %cst_134 {dimension_numbers = #tpu.dot_dimension_numbers<[1], [0], [0], [1], [0, 0, 1, 1], [], []>} : vector<9x36xbf16>, vector<36x153xbf16>, vector<9x153xf32> -> vector<9x153xf32>
    %c2_135 = arith.constant 2 : index
    %c0_136 = arith.constant 0 : index
    %c0_137 = arith.constant 0 : index
    %146 = vector.load %arg6[%c2_135, %c0_136, %c0_137] : memref<3x1x51xf32, #tpu.memory_space<vmem>>, vector<1x1x51xf32>
    %147 = vector.shape_cast %146 : vector<1x1x51xf32> to vector<1x51xf32>
    %c2_138 = arith.constant 2 : index
    %c0_139 = arith.constant 0 : index
    %c0_140 = arith.constant 0 : index
    %c0_141 = arith.constant 0 : index
    %148 = vector.load %arg5[%c2_138, %c0_139, %c0_140, %c0_141] : memref<3x3x17x9xf32, #tpu.memory_space<vmem>>, vector<1x1x17x9xf32>
    %149 = vector.shape_cast %148 : vector<1x1x17x9xf32> to vector<17x9xf32>
    %150 = vector.extract_strided_slice %145 {offsets = [0, 0], sizes = [9, 51], strides = [1, 1]} : vector<9x153xf32> to vector<9x51xf32>
    %cst_142 = arith.constant dense<0.000000e+00> : vector<17x51xf32>
    %151 = tpu.matmul %149, %150, %cst_142 {dimension_numbers = #tpu.dot_dimension_numbers<[1], [0], [0], [1], [0, 0, 1, 1], [], []>} : vector<17x9xf32>, vector<9x51xf32>, vector<17x51xf32> -> vector<17x51xf32>
    %152 = vector.broadcast %147 : vector<1x51xf32> to vector<17x51xf32>
    %153 = arith.addf %152, %151 : vector<17x51xf32>
    %c2_143 = arith.constant 2 : index
    %c1_144 = arith.constant 1 : index
    %c0_145 = arith.constant 0 : index
    %c0_146 = arith.constant 0 : index
    %154 = vector.load %arg5[%c2_143, %c1_144, %c0_145, %c0_146] : memref<3x3x17x9xf32, #tpu.memory_space<vmem>>, vector<1x1x17x9xf32>
    %155 = vector.shape_cast %154 : vector<1x1x17x9xf32> to vector<17x9xf32>
    %156 = vector.extract_strided_slice %145 {offsets = [0, 51], sizes = [9, 51], strides = [1, 1]} : vector<9x153xf32> to vector<9x51xf32>
    %cst_147 = arith.constant dense<0.000000e+00> : vector<17x51xf32>
    %157 = tpu.matmul %155, %156, %cst_147 {dimension_numbers = #tpu.dot_dimension_numbers<[1], [0], [0], [1], [0, 0, 1, 1], [], []>} : vector<17x9xf32>, vector<9x51xf32>, vector<17x51xf32> -> vector<17x51xf32>
    %158 = arith.addf %153, %157 : vector<17x51xf32>
    %c2_148 = arith.constant 2 : index
    %c2_149 = arith.constant 2 : index
    %c0_150 = arith.constant 0 : index
    %c0_151 = arith.constant 0 : index
    %159 = vector.load %arg5[%c2_148, %c2_149, %c0_150, %c0_151] : memref<3x3x17x9xf32, #tpu.memory_space<vmem>>, vector<1x1x17x9xf32>
    %160 = vector.shape_cast %159 : vector<1x1x17x9xf32> to vector<17x9xf32>
    %161 = vector.extract_strided_slice %145 {offsets = [0, 102], sizes = [9, 51], strides = [1, 1]} : vector<9x153xf32> to vector<9x51xf32>
    %cst_152 = arith.constant dense<0.000000e+00> : vector<17x51xf32>
    %162 = tpu.matmul %160, %161, %cst_152 {dimension_numbers = #tpu.dot_dimension_numbers<[1], [0], [0], [1], [0, 0, 1, 1], [], []>} : vector<17x9xf32>, vector<9x51xf32>, vector<17x51xf32> -> vector<17x51xf32>
    %163 = arith.addf %158, %162 : vector<17x51xf32>
    %cst_153 = arith.constant 0.000000e+00 : f32
    %164 = vector.broadcast %cst_153 : f32 to vector<17x51xf32>
    %165 = arith.maximumf %163, %164 : vector<17x51xf32>
    %166 = math.tanh %165 : vector<17x51xf32>
    %c0_154 = arith.constant 0 : index
    %c0_155 = arith.constant 0 : index
    %c0_156 = arith.constant 0 : index
    %167 = vector.load %arg7[%c0_154, %c0_155, %c0_156] : memref<1x17x51xf32, #tpu.memory_space<vmem>>, vector<1x17x51xf32>
    %168 = vector.shape_cast %167 : vector<1x17x51xf32> to vector<17x51xf32>
    %169 = vector.shape_cast %166 : vector<17x51xf32> to vector<1x17x51xf32>
    tpu.vector_store %arg7[%c0_154, %c0_155, %c0_156], %169 {strides = array<i32>} : memref<1x17x51xf32, #tpu.memory_space<vmem>>, vector<1x17x51xf32>,
    return
  }
  func.func @transform_0(%arg0: i32) -> (i32, i32, i32) {
    %c0_i32 = arith.constant 0 : i32
    %c0_i32_0 = arith.constant 0 : i32
    %c0_i32_1 = arith.constant 0 : i32
    return %arg0, %c0_i32, %c0_i32_0 : i32, i32, i32
  }
  func.func @transform_1(%arg0: i32) -> (i32, i32, i32, i32) {
    %c0_i32 = arith.constant 0 : i32
    %c0_i32_0 = arith.constant 0 : i32
    %c0_i32_1 = arith.constant 0 : i32
    %c0_i32_2 = arith.constant 0 : i32
    %c0_i32_3 = arith.constant 0 : i32
    return %c0_i32, %c0_i32_0, %c0_i32_1, %c0_i32_2 : i32, i32, i32, i32
  }
  func.func @transform_2(%arg0: i32) -> (i32, i32, i32) {
    %c0_i32 = arith.constant 0 : i32
    %c0_i32_0 = arith.constant 0 : i32
    %c0_i32_1 = arith.constant 0 : i32
    %c0_i32_2 = arith.constant 0 : i32
    return %c0_i32, %c0_i32_0, %c0_i32_1 : i32, i32, i32
  }
  func.func @transform_3(%arg0: i32) -> (i32, i32, i32) {
    %c0_i32 = arith.constant 0 : i32
    %c0_i32_0 = arith.constant 0 : i32
    %c0_i32_1 = arith.constant 0 : i32
    %c0_i32_2 = arith.constant 0 : i32
    return %c0_i32, %c0_i32_0, %c0_i32_1 : i32, i32, i32
  }
  func.func @transform_4(%arg0: i32) -> (i32, i32, i32, i32) {
    %c0_i32 = arith.constant 0 : i32
    %c0_i32_0 = arith.constant 0 : i32
    %c0_i32_1 = arith.constant 0 : i32
    %c0_i32_2 = arith.constant 0 : i32
    %c0_i32_3 = arith.constant 0 : i32
    return %c0_i32, %c0_i32_0, %c0_i32_1, %c0_i32_2 : i32, i32, i32, i32
  }
  func.func @transform_5(%arg0: i32) -> (i32, i32, i32) {
    %c0_i32 = arith.constant 0 : i32
    %c0_i32_0 = arith.constant 0 : i32
    %c0_i32_1 = arith.constant 0 : i32
    %c0_i32_2 = arith.constant 0 : i32
    return %c0_i32, %c0_i32_0, %c0_i32_1 : i32, i32, i32
  }
  func.func @transform_6(%arg0: i32) -> (i32, i32, i32) {
    %c0_i32 = arith.constant 0 : i32
    %c0_i32_0 = arith.constant 0 : i32
    %c0_i32_1 = arith.constant 0 : i32
    return %arg0, %c0_i32, %c0_i32_0 : i32, i32, i32
  }
}

</mosaic_0001>

<bundles_post_ra>
// kernel: tpu_custom_call.1
= control target key start
LH: loop header
LB: loop body
LE: loop exit
PB: predicated region body
PF: predicated region fallthrough
CT: control target
= control target key end

     0   :  { %s3948_s21 = smov 0   ;;  %s4507_s0 = inlined_call_operand.vmem [shape: f32[2,32,128], index: 0, kind: input, shape index: {}]   ;;  %s4508_s1 = inlined_call_operand.vmem [shape: bf16[3,3,16,32], index: 1, kind: input, shape index: {}]   ;;  %s4509_s2 = inlined_call_operand.vmem [shape: bf16[3,512,64], index: 2, kind: input, shape index: {}]   ;;  %s4510_s3 = inlined_call_operand.vmem [shape: bf16[3,48,153], index: 3, kind: input, shape index: {}]   ;;  %s4511_s4 = inlined_call_operand.vmem [shape: f32[3,3,17,9], index: 4, kind: input, shape index: {}]   ;;  %s4512_s5 = inlined_call_operand.vmem [shape: f32[3,1,51], index: 5, kind: input, shape index: {}]   ;;  %s4513_s6 = inlined_call_operand.vmem [shape: f32[2,17,51], index: 6, kind: output, shape index: {}]  }
   0x1 LB: > { %s3032_s22 = sadd.s32 4294967295, %s3897_s21   ;;  %p3036_p0 = scmp.ge.s32.totalorder %s3897_s21, 1  ;;  %s3897_s21 = sphi %s3948_s21, %s16_s21  }
   0x2   : > { %p212_p1 = scmp.lt.s32.totalorder %s3897_s21, 3 }
   0x4   : > { %p213_p2 = pnand %p3036_p0, %p212_p1 }
   0x5   : > { %p242_p3 = scmp.lt.s32.totalorder (!%p213_p2), %s3032_s22, 1  ;;  %s3902_s7 = smov (!%p213_p2), 124  }
   0x6   : > { %216 = sbr.rel (%p213_p2) target bundleno = 3225 (0xc99), region = 44  ;;  %s3904_s12 = smov (!%p213_p2), 120  }
   0x7   : > { %s3905_s25 = smov (!%p213_p2), 112   ;;  %s3906_s28 = smov (!%p213_p2), 48  }
   0x8   : > { %s3907_s29 = smov (!%p213_p2), 88   ;;  %s3908_s20 = smov (!%p213_p2), 56  }
   0x9   : > { %s3911_s24 = smov (!%p213_p2), 77  }
   0xb   : > { %v3899_v0 = vmov 0.0   ;;  %s4515_s22 = smov (!%p242_p3, %s3032_s22), 1  ;;  %vm3900_vm0 = vmmov 0   ;;  %v3901_v6 = vmov 0.0|0.0   ;;  %v3761_v9 = vld [vmem:[%s4509_s2 + $0x78] sm:$0xff]   ;;  %v3758_v10 = vld [vmem:[%s4508_s1] sm:$0xff]   ;;  %v253_v24 = vlaneseq }
   0xc   : > { %3581 = vmatprep.subr.bf16.mxu0 %v3899_v0  ;;  %3589 = vmatprep.subr.bf16.mxu1 %v3899_v0  ;;  %s3383_s23 = sshll.u32 %s4515_s22, 5  ;;  %v3040_v7 = vcombine.low %v3901_v6, %v3901_v6  ;;  %v3759_v11 = vld [vmem:[%s4508_s1 + $0x8] sm:$0xff]   ;;  %vm299_vm1 = vcmask 261120   ;;  %v3762_v12 = vld [vmem:[%s4509_s2 + $0x38] sm:$0xff]   ;;  %v3763_v13 = vld [vmem:[%s4509_s2 + $0x70] sm:$0xff]   ;;  %vm844_vm3 = vcmask 1046528  }
   0xd   : > { %3585 = vmatprep.mubr.msk.bf16.mxu0 %vm3900_vm0, %v3899_v0  ;;  %3593 = vmatprep.mubr.msk.bf16.mxu1 %vm3900_vm0, %v3899_v0  ;;  %s246_s26 = scalar_lea.vmem %s4507_s0, %s3383_s23  ;;  %v3764_v14 = vld [vmem:[%s4509_s2 + $0x30] sm:$0xff]   ;;  %v3766_v15 = vld [vmem:[%s4509_s2 + $0xf8] sm:$0xff]   ;;  %v3765_v16 = vld [vmem:[%s4509_s2 + $0x68] sm:$0xff]   ;;  %v254_v29 = vand.u32 127, %v253_v24  ;;  %vm869_vm4 = vcmask 1047552   ;;  %vm865_vm5 = vcmask 121856  }
   0xe   : > { %v288_v1 = vld [vmem:[%s246_s26 + $0x10] sm:$0xff]  ;;  %v289_v2 = vld [vmem:[%s246_s26 + $0x18] sm:$0xff]  ;;  %v286_v3 = vld [vmem:[%s246_s26] sm:$0xff]  ;;  %282 = vst [vmem:[#allocation2] sm:$0xff] %v3040_v7  ;;  %vm916_vm6 = vcmask 486400   ;;  %vm1382_vm7 = vcmask 1042432  }
   0xf   : > { %v291_v4 = vpack.c.bf16 %v289_v2, %v288_v1  ;;  %v287_v5 = vld [vmem:[%s246_s26 + $0x8] sm:$0xff]  ;;  %284 = vst [vmem:[#allocation2 + $0x10] sm:$0xff] %v3040_v7  ;;  %v3760_v17 = vld [vmem:[%s4508_s1 + $0x10] sm:$0xff]   ;;  %v3768_v18 = vld [vmem:[%s4509_s2 + $0xb8] sm:$0xff]   ;;  %v257_v30 = vadd.s32 384, %v254_v29  ;;  %vm1383_vm8 = vcmask 1043456  }
  0x10   : > { %v290_v8 = vpack.c.bf16 %v287_v5, %v286_v3  ;;  %v3767_v19 = vld [vmem:[%s4509_s2 + $0x28] sm:$0xff]   ;;  %v3770_v20 = vld [vmem:[%s4509_s2 + $0xf0] sm:$0xff]   ;;  %v3769_v21 = vld [vmem:[%s4509_s2 + $0x60] sm:$0xff]   ;;  %vm1378_vm9 = vcmask 56320   ;;  %vm1430_vm10 = vcmask 451584   ;;  %vm1914_vm11 = vcmask 392192  }
  0x11   : > { %3582 = vmatpush3.bf16.msra.mxu0 %v291_v4  ;;  %3590 = vmatpush3.bf16.msra.mxu1 %v291_v4  ;;  %v3772_v22 = vld [vmem:[%s4509_s2 + $0xb0] sm:$0xff]   ;;  %v3771_v23 = vld [vmem:[%s4509_s2 + $0x20] sm:$0xff]   ;;  %v3773_v25 = vld [vmem:[%s4509_s2 + $0x58] sm:$0xff]   ;;  %vm261_vm2 = vcmp.eq.s32.totalorder %v257_v30, 384  ;;  %vm1960_vm12 = vcmask 23552   ;;  %vm2227_vm13 = vcmask 326656  }
  0x12   : > { %3583 = vmatprep.subr.bf16.mxu0 %v3899_v0  ;;  %3591 = vmatprep.subr.bf16.mxu1 %v3899_v0  ;;  %v3774_v26 = vld [vmem:[%s4509_s2 + $0xe8] sm:$0xff]   ;;  %v3775_v27 = vld [vmem:[%s4509_s2 + $0x18] sm:$0xff]   ;;  %v3777_v31 = vld [vmem:[%s4509_s2 + $0x50] sm:$0xff]   ;;  %v265_v35 = vsel %vm261_vm2, 1.0, %v3899_v0  ;;  %vm2279_vm14 = vcmask 39936   ;;  %vm2286_vm15 = vcmask 1044480  }
  0x13   : > { %v3776_v28 = vld [vmem:[%s4509_s2 + $0xa8] sm:$0xff]   ;;  %v3778_v32 = vld [vmem:[%s4509_s2 + $0xe0] sm:$0xff]   ;;  %v3779_v33 = vld [vmem:[%s4509_s2 + $0x10] sm:$0xff]   ;;  %v269_v36 = vpack.c.bf16 %v265_v35, %v265_v35  ;;  %s3909_s23 = smov 92   ;;  %vm2587_vm2 = vcmask 293888  }
  0x14   : > { %v3780_v34 = vld [vmem:[%s4509_s2 + $0xa0] sm:$0xff]   ;;  %v3781_v37 = vld [vmem:[%s4509_s2 + $0x48] sm:$0xff]   ;;  %v3782_v38 = vld [vmem:[%s4509_s2 + $0xd8] sm:$0xff]  }
  0x15   : > { %3584 = vmatpush3.bf16.msra.mxu0 %v290_v8  ;;  %3592 = vmatpush3.bf16.msra.mxu1 %v290_v8  ;;  %v3041_v39 = vcombine.low %v3901_v6, %v269_v36  ;;  %v3783_v40 = vld [vmem:[%s4509_s2 + $0x8] sm:$0xff]   ;;  %v3784_v41 = vld [vmem:[%s4509_s2 + $0x98] sm:$0xff]   ;;  %v3785_v42 = vld [vmem:[%s4509_s2 + $0x40] sm:$0xff]  }
  0x16   : > { %3597 = vmatprep.subr.bf16.mxu0 %v3899_v0  ;;  %3399 = vmatprep.subr.bf16.mxu1 %v3761_v9  ;;  %v3786_v43 = vld [vmem:[%s4509_s2 + $0xd0] sm:$0xff]   ;;  %v3787_v44 = vld [vmem:[%s4509_s2] sm:$0xff]   ;;  %v3792_v46 = vld [vmem:[%s4509_s2 + $0xc8] sm:$0xff]  }
  0x17   : > { %283 = vst [vmem:[#allocation2 + $0x8] sm:$0xff] %v3041_v39  ;;  %285 = vst [vmem:[#allocation2 + $0x18] sm:$0xff] %v3041_v39  ;;  %v3788_v45 = vld [vmem:[%s4509_s2 + $0x90] sm:$0xff]   ;;  %v3793_v47 = vld [vmem:[%s4509_s2 + $0x88] sm:$0xff]  }
  0x18   : > { %3586 = vmatmul.mubr.msk.bf16.vlgmr.msra.gmra.mxu0 %vm299_vm1, %v3758_v10  ;;  %3594 = vmatmul.mubr.msk.bf16.vlgmr.msra.gmra.mxu1 %vm299_vm1, %v3759_v11  ;;  %v3794_v48 = vld [vmem:[%s4509_s2 + $0xc0] sm:$0xff]  }
  0x19   : > { %3598 = vmatpush3.bf16.msra.mxu0 %v291_v4  ;;  %3601 = vmatprep.mubr.msk.bf16.mxu0 %vm3900_vm0, %v3899_v0  ;;  %v3795_v49 = vld [vmem:[%s4509_s2 + $0x80] sm:$0xff]  }
  0x1a   : > { %3599 = vmatprep.subr.bf16.mxu0 %v3899_v0  ;;  %3400 = vmatpush3.bf16.msra.mxu1 %v3762_v12 }
  0x1b   : > { %3401 = vmatprep.subr.bf16.mxu1 %v3763_v13 }
  0x1d   : > { %3600 = vmatpush3.bf16.msra.mxu0 %v290_v8 }
  0x1e   : > { %3402 = vmatpush3.bf16.msra.mxu1 %v3764_v14  ;;  %3421 = vmatprep.subr.bf16.mxu0 %v3766_v15  ;;  %v3798_v8 = vld [vmem:[#allocation2 + $0xc] ss:$16 sps:$4 sm:$0xff]  }
  0x1f   : > { %3403 = vmatprep.subr.bf16.mxu1 %v3765_v16 }
  0x20   : > { %3602 = vmatmul.mubr.msk.bf16.vlgmr.msra.gmra.mxu0 %vm299_vm1, %v3760_v17  ;;  %vm2591_vm1 = vcmask 1041408  }
  0x21   : > { %3422 = vmatpush3.bf16.msra.mxu0 %v3768_v18  ;;  %831 = vmatprep.mubr.bf16.mxu0 %v3798_v8  ;;  %v3826_v8 = vld [vmem:[%s4509_s2 + $0x190] sm:$0xff]  }
  0x22   : > { %3404 = vmatpush3.bf16.msra.mxu1 %v3767_v19  ;;  %3423 = vmatprep.subr.bf16.mxu0 %v3770_v20 }
  0x23   : > { %3405 = vmatprep.subr.bf16.mxu1 %v3769_v21 }
  0x25   : > { %3424 = vmatpush3.bf16.msra.mxu0 %v3772_v22 }
  0x26   : > { %3406 = vmatpush3.bf16.msra.mxu1 %v3771_v23  ;;  %3425 = vmatprep.subr.bf16.mxu0 %v3774_v26 }
  0x27   : > { %3407 = vmatprep.subr.bf16.mxu1 %v3773_v25 }
  0x29   : > { %3426 = vmatpush3.bf16.msra.mxu0 %v3776_v28 }
  0x2a   : > { %3408 = vmatpush3.bf16.msra.mxu1 %v3775_v27  ;;  %3427 = vmatprep.subr.bf16.mxu0 %v3778_v32  ;;  %v3903_v32 = vmov 65535  }
  0x2b   : > { %3409 = vmatprep.subr.bf16.mxu1 %v3777_v31 }
  0x2d   : > { %3428 = vmatpush3.bf16.msra.mxu0 %v3780_v34 }
  0x2e   : > { %3410 = vmatpush3.bf16.msra.mxu1 %v3779_v33  ;;  %3429 = vmatprep.subr.bf16.mxu0 %v3782_v38  ;;  %v870_v33 = vsel %vm844_vm3, 4294967295, %v3903_v32 }
  0x2f   : > { %3411 = vmatprep.subr.bf16.mxu1 %v3781_v37  ;;  %v871_v38 = vsel %vm869_vm4, %v870_v33, 0  ;;  %vm2647_vm4 = vcmask 72704  }
  0x31   : > { %3430 = vmatpush3.bf16.msra.mxu0 %v3784_v41 }
  0x32   : > { %3412 = vmatpush3.bf16.msra.mxu1 %v3783_v40  ;;  %3431 = vmatprep.subr.bf16.mxu0 %v3786_v43  ;;  %v3799_v40 = vld [vmem:[%s4509_s2 + $0x178] sm:$0xff]   ;;  %v3096_v43 = vld [vmem:[%s4508_s1 + $0x20] sm:$0xf] }
  0x33   : > { %3413 = vmatprep.subr.bf16.mxu1 %v3785_v42  ;;  %v3094_v42 = vld [vmem:[%s4508_s1 + $0x18] sm:$0xf] }
  0x35   : > { %3432 = vmatpush3.bf16.msra.mxu0 %v3788_v45  ;;  %v3804_v45 = vld [vmem:[%s4509_s2 + $0x1f8] sm:$0xff]  }
  0x36   : > { %3414 = vmatpush3.bf16.msra.mxu1 %v3787_v44  ;;  %3433 = vmatprep.subr.bf16.mxu0 %v3792_v46  ;;  %v3800_v44 = vld [vmem:[%s4509_s2 + $0x138] sm:$0xff]   ;;  %v3801_v46 = vld [vmem:[%s4509_s2 + $0x170] sm:$0xff]  }
  0x37   : > { %3605 = vmatprep.subr.bf16.mxu1 %v3899_v0 }
  0x39   : > { %3434 = vmatpush3.bf16.msra.mxu0 %v3793_v47  ;;  %v3802_v47 = vld [vmem:[%s4509_s2 + $0x130] sm:$0xff]  }
  0x3a   : > { %3435 = vmatprep.subr.bf16.mxu0 %v3794_v48  ;;  %v3803_v48 = vld [vmem:[%s4509_s2 + $0x168] sm:$0xff]  }
  0x3d   : > { %3436 = vmatpush3.bf16.msra.mxu0 %v3795_v49  ;;  %v3098_v49 = vld [vmem:[%s4508_s1 + $0x28] sm:$0xf] }
  0x3e   : > { %3611 = vmatprep.subr.bf16.mxu0 %v3899_v0 }
  0xd8   : > { %v337_v50 = vpop.f32.mrf.mxu0  ;;  %v399_v51 = vpop.f32.mrf.mxu1 }
  0xd9   : > { %v3384_v52 = vpack.c.bf16 %v337_v50, %v337_v50  ;;  %v3386_v53 = vpack.c.bf16 %v399_v51, %v399_v51  ;;  %v3806_v50 = vld [vmem:[%s4509_s2 + $0x1b8] sm:$0xff]   ;;  %v3805_v51 = vld [vmem:[%s4509_s2 + $0x128] sm:$0xff]  }
  0xda   : > { %v3587_v54 = vpop.f32.mrf.mxu0  ;;  %v3595_v55 = vpop.f32.mrf.mxu1 }
  0xdb   : > { %352 = vst [vmem:[#allocation2] sm:$0xf] %v3384_v52  ;;  %414 = vst [vmem:[#allocation2 + $0x4] sm:$0xf] %v3386_v53  ;;  %v3808_v52 = vld [vmem:[%s4509_s2 + $0x1f0] sm:$0xff]   ;;  %v3807_v53 = vld [vmem:[%s4509_s2 + $0x160] sm:$0xff]  }
  0xdc   : > { %v340_v56 = vpop.f32.mrf.mxu0  ;;  %v402_v57 = vpop.f32.mrf.mxu1  ;;  %v3810_v54 = vld [vmem:[%s4509_s2 + $0x1b0] sm:$0xff]   ;;  %v3809_v55 = vld [vmem:[%s4509_s2 + $0x120] sm:$0xff]  }
  0xdd   : > { %v3385_v58 = vpack.c.bf16 %v340_v56, %v340_v56  ;;  %v3387_v59 = vpack.c.bf16 %v402_v57, %v402_v57  ;;  %v3812_v56 = vld [vmem:[%s4509_s2 + $0x1e8] sm:$0xff]   ;;  %v3811_v57 = vld [vmem:[%s4509_s2 + $0x158] sm:$0xff]  }
  0xde   : > { %v3588_v60 = vpop.f32.mrf.mxu0  ;;  %v3596_v61 = vpop.f32.mrf.mxu1 }
  0xdf   : > { %353 = vst [vmem:[#allocation2 + $0x10] sm:$0xf] %v3385_v58  ;;  %415 = vst [vmem:[#allocation2 + $0x14] sm:$0xf] %v3387_v59  ;;  %v3814_v58 = vld [vmem:[%s4509_s2 + $0x1a8] sm:$0xff]   ;;  %v3813_v59 = vld [vmem:[%s4509_s2 + $0x118] sm:$0xff]  }
  0xe0   : > { %v461_v62 = vpop.f32.mrf.mxu0  ;;  %v3815_v60 = vld [vmem:[%s4509_s2 + $0x150] sm:$0xff]   ;;  %v3816_v61 = vld [vmem:[%s4509_s2 + $0x1e0] sm:$0xff]  }
  0xe1   : > { %v3388_v63 = vpack.c.bf16 %v461_v62, %v461_v62  ;;  %v3817_v62 = vld [vmem:[%s4509_s2 + $0x110] sm:$0xff]  }
  0xe2   : > { %v3603_v1 = vpop.f32.mrf.mxu0 }
  0xe3   : > { %476 = vst [vmem:[#allocation2 + $0x8] sm:$0xf] %v3388_v63  ;;  %v3818_v63 = vld [vmem:[%s4509_s2 + $0x1a0] sm:$0xff]   ;;  %v3819_v1 = vld [vmem:[%s4509_s2 + $0x148] sm:$0xff]  }
  0xe4   : > { %v464_v2 = vpop.f32.mrf.mxu0 }
  0xe5   : > { %v3389_v3 = vpack.c.bf16 %v464_v2, %v464_v2  ;;  %v3820_v2 = vld [vmem:[%s4509_s2 + $0x1d8] sm:$0xff]  }
  0xe6   : > { %v3604_v4 = vpop.f32.mrf.mxu0  ;;  %v3789_v5 = vld [vmem:[#allocation2] ss:$16 sps:$4 sm:$0xff]   ;;  %v3791_v6 = vld [vmem:[#allocation2 + $0x4] ss:$16 sps:$4 sm:$0xff]  }
  0xe7   : > { %477 = vst [vmem:[#allocation2 + $0x18] sm:$0xf] %v3389_v3  ;;  %790 = vmatprep.mubr.bf16.mxu1 %v3791_v6  ;;  %v3821_v3 = vld [vmem:[%s4509_s2 + $0x108] sm:$0xff]   ;;  %v3822_v4 = vld [vmem:[%s4509_s2 + $0x198] sm:$0xff]   ;;  %v3824_v6 = vld [vmem:[%s4509_s2 + $0x1d0] sm:$0xff]  }
  0xe8   : > { %791 = vmatmul.mubr.bf16.vlgmr.msra.gmra.mxu1 %v3789_v5  ;;  %v3823_v5 = vld [vmem:[%s4509_s2 + $0x140] sm:$0xff]  }
  0xe9   : > { %3607 = vmatprep.mubr.msk.bf16.mxu1 %vm3900_vm0, %v3899_v0 }
  0xee   : > { %v3796_v7 = vld [vmem:[#allocation2 + $0x8] ss:$16 sps:$4 sm:$0xff]  }
  0xef   : > { %832 = vmatmul.mubr.bf16.vlgmr.msra.gmra.mxu0 %v3796_v7  ;;  %v3825_v7 = vld [vmem:[%s4509_s2 + $0x100] sm:$0xff]  }
  0xf0   : > { %3613 = vmatprep.mubr.msk.bf16.mxu0 %vm3900_vm0, %v3899_v0 }
 0x1a8   : > { %v3415_v9 = vpop.f32.mrf.mxu1 }
 0x1aa   : > { %v3416_v10 = vpop.f32.mrf.mxu1 }
 0x1ab   : > { %v3417_v14 = vadd.f32 %v3416_v10, %v3415_v9  ;;  %v3829_v9 = vld [vmem:[%s4509_s2 + $0x1c8] sm:$0xff]  }
 0x1ac   : > { %v3418_v11 = vpop.f32.mrf.mxu1  ;;  %v3830_v10 = vld [vmem:[%s4509_s2 + $0x188] sm:$0xff]  }
 0x1ae   : > { %v3419_v16 = vpop.f32.mrf.mxu1 }
 0x1af   : > { %v3437_v12 = vpop.f32.mrf.mxu0  ;;  %v3420_v20 = vadd.f32 %v3419_v16, %v3418_v11  ;;  %v3831_v11 = vld [vmem:[%s4509_s2 + $0x1c0] sm:$0xff]  }
 0x1b1   : > { %v3438_v13 = vpop.f32.mrf.mxu0 }
 0x1b2   : > { %v3439_v15 = vadd.f32 %v3438_v13, %v3437_v12  ;;  %v3832_v12 = vld [vmem:[%s4509_s2 + $0x180] sm:$0xff]  }
 0x1b3   : > { %v3440_v17 = vpop.f32.mrf.mxu0 }
 0x1b4   : > { %v834_v18 = vadd.f32 %v3439_v15, %v3417_v14 }
 0x1b5   : > { %v3441_v19 = vpop.f32.mrf.mxu0 }
 0x1b6   : > { %v3442_v21 = vadd.f32 %v3441_v19, %v3440_v17  ;;  %v840_v22 = vmax.f32 %v834_v18, 0.0 }
 0x1b8   : > { %v837_v23 = vadd.f32 %v3442_v21, %v3420_v20  ;;  %v845_v25 = vrot.slane %v840_v22, 1 }
 0x1ba   : > { %v841_v24 = vmax.f32 %v837_v23, 0.0 }
 0x1bc   : > { %v846_v26 = vrot.slane %v841_v24, 1 }
 0x1be   : > { %v847_v27 = vsel %vm844_vm3, %v845_v25, %v846_v26  ;;  %v851_v28 = vmax.f32 %v841_v24, %v846_v26  ;;  %vm2657_vm3 = vcmask 1040384  }
 0x1bf   : > { %v850_v29 = vmax.f32 %v840_v22, %v847_v27 }
 0x1c1   : > { %v3753_v30 = vpack.i.bf16 %v851_v28, %v850_v29 }
 0x1c3   : > { %3754 = vrot.lane.b32.xlu0 %v3753_v30, %s3902_s7 }
 0x235   : > { %v3755_v31 = vpop.permute.xlu0 %3754 }
 0x236   : > { %v3757_v34 = vunpack.i.h.bf16 %v3755_v31  ;;  %v3756_v35 = vunpack.i.l.bf16 %v3755_v31 }
 0x238   : > { %v861_v36 = vmax.f32 %v851_v28, %v3757_v34  ;;  %v860_v37 = vmax.f32 %v850_v29, %v3756_v35 }
 0x23a   : > { %v862_v39 = vpack.c.bf16 %v861_v36, %v860_v37 }
 0x23c   : > { %v873_v41 = vand.u32 %v871_v38, %v862_v39 }
 0x23e   : > { %3606 = vmatpush3.bf16.msra.mxu1 %v873_v41  ;;  %3612 = vmatpush3.bf16.msra.mxu0 %v873_v41 }
 0x23f   : > { %3617 = vmatprep.subr.bf16.mxu1 %v3899_v0  ;;  %3449 = vmatprep.subr.bf16.mxu0 %v3799_v40 }
 0x241   : > { %3608 = vmatmul.mubr.msk.bf16.vlgmr.msra.gmra.mxu1 %vm865_vm5, %v3094_v42  ;;  %3614 = vmatmul.mubr.msk.bf16.vlgmr.msra.gmra.mxu0 %vm865_vm5, %v3096_v43 }
 0x242   : > { %3618 = vmatpush3.bf16.msra.mxu1 %v873_v41  ;;  %3619 = vmatprep.mubr.msk.bf16.mxu1 %vm3900_vm0, %v3899_v0 }
 0x243   : > { %3450 = vmatpush3.bf16.msra.mxu0 %v3800_v44  ;;  %3471 = vmatprep.subr.bf16.mxu1 %v3804_v45 }
 0x244   : > { %3451 = vmatprep.subr.bf16.mxu0 %v3801_v46 }
 0x247   : > { %3452 = vmatpush3.bf16.msra.mxu0 %v3802_v47 }
 0x248   : > { %3453 = vmatprep.subr.bf16.mxu0 %v3803_v48 }
 0x249   : > { %3620 = vmatmul.mubr.msk.bf16.vlgmr.msra.gmra.mxu1 %vm865_vm5, %v3098_v49  ;;  %v1384_v49 = vsel %vm1382_vm7, 4294967295, %v3903_v32  ;;  %v3202_v32 = vld [vmem:[%s4508_s1 + $0x38] sm:$0x3]  ;;  %vm2868_vm5 = vcmask 211968  }
 0x24a   : > { %3472 = vmatpush3.bf16.msra.mxu1 %v3806_v50 }
 0x24b   : > { %3454 = vmatpush3.bf16.msra.mxu0 %v3805_v51  ;;  %3473 = vmatprep.subr.bf16.mxu1 %v3808_v52  ;;  %v1385_v52 = vsel %vm1383_vm8, %v1384_v49, 0  ;;  %v3872_v49 = vld [vmem:[%s4510_s3 + $0x10] ss:$8 sps:$4 sm:$0xff]  }
 0x24c   : > { %3455 = vmatprep.subr.bf16.mxu0 %v3807_v53 }
 0x24e   : > { %3474 = vmatpush3.bf16.msra.mxu1 %v3810_v54  ;;  %v3835_v54 = vld [vmem:[%s4509_s2 + $0x278] sm:$0xff]  }
 0x24f   : > { %3456 = vmatpush3.bf16.msra.mxu0 %v3809_v55  ;;  %3475 = vmatprep.subr.bf16.mxu1 %v3812_v56  ;;  %v3200_v56 = vld [vmem:[%s4508_s1 + $0x30] sm:$0x3] }
 0x250   : > { %3457 = vmatprep.subr.bf16.mxu0 %v3811_v57  ;;  %v3836_v57 = vld [vmem:[%s4509_s2 + $0x238] sm:$0xff]  }
 0x252   : > { %3476 = vmatpush3.bf16.msra.mxu1 %v3814_v58  ;;  %v3840_v58 = vld [vmem:[%s4509_s2 + $0x2f8] sm:$0xff]  }
 0x253   : > { %3458 = vmatpush3.bf16.msra.mxu0 %v3813_v59  ;;  %3477 = vmatprep.subr.bf16.mxu1 %v3816_v61  ;;  %v3837_v59 = vld [vmem:[%s4509_s2 + $0x270] sm:$0xff]   ;;  %v3839_v61 = vld [vmem:[%s4509_s2 + $0x268] sm:$0xff]  }
 0x254   : > { %3459 = vmatprep.subr.bf16.mxu0 %v3815_v60  ;;  %v3838_v60 = vld [vmem:[%s4509_s2 + $0x230] sm:$0xff]  }
 0x256   : > { %3478 = vmatpush3.bf16.msra.mxu1 %v3818_v63  ;;  %v3842_v63 = vld [vmem:[%s4509_s2 + $0x2b8] sm:$0xff]  }
 0x257   : > { %3460 = vmatpush3.bf16.msra.mxu0 %v3817_v62  ;;  %3479 = vmatprep.subr.bf16.mxu1 %v3820_v2  ;;  %v3204_v62 = vld [vmem:[%s4508_s1 + $0x40] sm:$0x3]  ;;  %v3844_v2 = vld [vmem:[%s4509_s2 + $0x2f0] sm:$0xff]  }
 0x258   : > { %3461 = vmatprep.subr.bf16.mxu0 %v3819_v1  ;;  %v3841_v1 = vld [vmem:[%s4509_s2 + $0x228] sm:$0xff]  }
 0x25a   : > { %3480 = vmatpush3.bf16.msra.mxu1 %v3822_v4  ;;  %v3846_v4 = vld [vmem:[%s4509_s2 + $0x2b0] sm:$0xff]  }
 0x25b   : > { %3462 = vmatpush3.bf16.msra.mxu0 %v3821_v3  ;;  %3481 = vmatprep.subr.bf16.mxu1 %v3824_v6  ;;  %v3843_v3 = vld [vmem:[%s4509_s2 + $0x260] sm:$0xff]   ;;  %v3848_v6 = vld [vmem:[%s4509_s2 + $0x2e8] sm:$0xff]  }
 0x25c   : > { %3463 = vmatprep.subr.bf16.mxu0 %v3823_v5  ;;  %v3845_v5 = vld [vmem:[%s4509_s2 + $0x220] sm:$0xff]  }
 0x25e   : > { %3482 = vmatpush3.bf16.msra.mxu1 %v3826_v8  ;;  %v3850_v8 = vld [vmem:[%s4509_s2 + $0x2a8] sm:$0xff]  }
 0x25f   : > { %3464 = vmatpush3.bf16.msra.mxu0 %v3825_v7  ;;  %3483 = vmatprep.subr.bf16.mxu1 %v3829_v9  ;;  %v3847_v7 = vld [vmem:[%s4509_s2 + $0x258] sm:$0xff]  }
 0x260   : > { %3623 = vmatprep.subr.bf16.mxu0 %v3899_v0  ;;  %v3849_v9 = vld [vmem:[%s4509_s2 + $0x218] sm:$0xff]  }
 0x262   : > { %3484 = vmatpush3.bf16.msra.mxu1 %v3830_v10  ;;  %v3851_v10 = vld [vmem:[%s4509_s2 + $0x250] sm:$0xff]  }
 0x263   : > { %3485 = vmatprep.subr.bf16.mxu1 %v3831_v11  ;;  %v3852_v11 = vld [vmem:[%s4509_s2 + $0x2e0] sm:$0xff]  }
 0x266   : > { %3486 = vmatpush3.bf16.msra.mxu1 %v3832_v12  ;;  %v3853_v12 = vld [vmem:[%s4509_s2 + $0x210] sm:$0xff]  }
 0x267   : > { %3629 = vmatprep.subr.bf16.mxu1 %v3899_v0 }
 0x301   : > { %v909_v13 = vpop.f32.mrf.mxu1  ;;  %v957_v14 = vpop.f32.mrf.mxu0 }
 0x302   : > { %v915_v15 = vpack.c.bf16 %v909_v13, %v909_v13  ;;  %v963_v16 = vpack.c.bf16 %v957_v14, %v957_v14  ;;  %v3854_v13 = vld [vmem:[%s4509_s2 + $0x2a0] sm:$0xff]   ;;  %v3855_v14 = vld [vmem:[%s4509_s2 + $0x248] sm:$0xff]  }
 0x303   : > { %v3609_v17 = vpop.f32.mrf.mxu1  ;;  %v3615_v18 = vpop.f32.mrf.mxu0 }
 0x304   : > { %917 = vst.msk [vmem:[#allocation2] sm:$0xf] %vm916_vm6, %v915_v15  ;;  %964 = vst.msk [vmem:[#allocation2 + $0x4] sm:$0xf] %vm916_vm6, %v963_v16  ;;  %v3856_v15 = vld [vmem:[%s4509_s2 + $0x2d8] sm:$0xff]   ;;  %v3857_v16 = vld [vmem:[%s4509_s2 + $0x208] sm:$0xff]  }
 0x305   : > { %v912_v19 = vpop.f32.mrf.mxu1  ;;  %v960_v20 = vpop.f32.mrf.mxu0  ;;  %v3858_v17 = vld [vmem:[%s4509_s2 + $0x298] sm:$0xff]   ;;  %v3859_v18 = vld [vmem:[%s4509_s2 + $0x240] sm:$0xff]  }
 0x306   : > { %v3860_v19 = vld [vmem:[%s4509_s2 + $0x2d0] sm:$0xff]   ;;  %v3861_v20 = vld [vmem:[%s4509_s2 + $0x200] sm:$0xff]  }
 0x307   : > { %v3610_v21 = vpop.f32.mrf.mxu1  ;;  %v3616_v22 = vpop.f32.mrf.mxu0 }
 0x308   : > { %v3862_v21 = vld [vmem:[%s4509_s2 + $0x290] sm:$0xff]   ;;  %v3865_v22 = vld [vmem:[%s4509_s2 + $0x2c8] sm:$0xff]  }
 0x309   : > { %v1004_v23 = vpop.f32.mrf.mxu1 }
 0x30a   : > { %v1010_v24 = vpack.c.bf16 %v1004_v23, %v1004_v23  ;;  %v3866_v23 = vld [vmem:[%s4509_s2 + $0x288] sm:$0xff]  }
 0x30b   : > { %v3621_v25 = vpop.f32.mrf.mxu1  ;;  %v1012_v26 = vld [vmem:[#allocation2] sm:$0xff] }
 0x30c   : > { %1011 = vst.msk [vmem:[#allocation2 + $0x8] sm:$0xf] %vm916_vm6, %v1010_v24  ;;  %v3165_v27 = vcombine.high %v1012_v26, %v1012_v26  ;;  %v3164_v28 = vcombine.low %v1012_v26, %v1012_v26  ;;  %v3867_v24 = vld [vmem:[%s4509_s2 + $0x2c0] sm:$0xff]   ;;  %vm2975_vm6 = vcmask 409600  }
 0x30d   : > { %v1007_v29 = vpop.f32.mrf.mxu1  ;;  %v3868_v25 = vld [vmem:[%s4509_s2 + $0x280] sm:$0xff]  }
 0x30e   : > { %1317 = vmatprep.mubr.bf16.mxu0 %v3165_v27 }
 0x30f   : > { %v3622_v30 = vpop.f32.mrf.mxu1  ;;  %1318 = vmatmul.mubr.bf16.vlgmr.msra.gmra.mxu0 %v3164_v28 }
 0x310   : > { %3625 = vmatprep.mubr.msk.bf16.mxu0 %vm3900_vm0, %v3899_v0 }
 0x313   : > { %v1013_v31 = vld [vmem:[#allocation2 + $0x8] sm:$0xff] }
 0x314   : > { %v3167_v33 = vcombine.high %v1013_v31, %v1013_v31  ;;  %v3166_v34 = vcombine.low %v1013_v31, %v1013_v31 }
 0x316   : > { %1357 = vmatprep.mubr.bf16.mxu1 %v3167_v33 }
 0x317   : > { %1358 = vmatmul.mubr.bf16.vlgmr.msra.gmra.mxu1 %v3166_v34 }
 0x318   : > { %3631 = vmatprep.mubr.msk.bf16.mxu1 %vm3900_vm0, %v3899_v0 }
 0x3cf   : > { %v3465_v35 = vpop.f32.mrf.mxu0 }
 0x3d1   : > { %v3466_v36 = vpop.f32.mrf.mxu0 }
 0x3d2   : > { %v3467_v41 = vadd.f32 %v3466_v36, %v3465_v35 }
 0x3d3   : > { %v3468_v37 = vpop.f32.mrf.mxu0 }
 0x3d5   : > { %v3469_v38 = vpop.f32.mrf.mxu0 }
 0x3d7   : > { %v3487_v39 = vpop.f32.mrf.mxu1 }
 0x3d9   : > { %v3488_v40 = vpop.f32.mrf.mxu1 }
 0x3da   : > { %v3489_v42 = vadd.f32 %v3488_v40, %v3487_v39 }
 0x3db   : > { %v3490_v43 = vpop.f32.mrf.mxu1 }
 0x3dc   : > { %v1360_v44 = vadd.f32 %v3489_v42, %v3467_v41 }
 0x3dd   : > { %v3491_v45 = vpop.f32.mrf.mxu1 }
 0x3de   : > { %v1365_v46 = vmax.f32 %v1360_v44, 0.0 }
 0x3e0   : > { %v1367_v47 = vrot.slane %v1365_v46, 1 }
 0x3e2   : > { %v1369_v48 = vmax.f32 %v1365_v46, %v1367_v47 }
 0x3e4   : > { %1371 = vrot.lane.b32.xlu0 %v1369_v48, %s3904_s12 }
 0x456   : > { %v1372_v50 = vpop.permute.xlu0 %1371 }
 0x457   : > { %v1374_v51 = vmax.f32 %v1369_v48, %v1372_v50  ;;  %v3871_v48 = vld [vmem:[%s4510_s3 + $0x20] ss:$8 sps:$4 sm:$0xff]  }
 0x459   : > { %v1375_v53 = vpack.c.bf16 %v1374_v51, %v1374_v51 }
 0x45b   : > { %v1387_v55 = vand.u32 %v1385_v52, %v1375_v53 }
 0x45d   : > { %3624 = vmatpush3.bf16.msra.mxu0 %v1387_v55  ;;  %3630 = vmatpush3.bf16.msra.mxu1 %v1387_v55 }
 0x45e   : > { %3635 = vmatprep.subr.bf16.mxu0 %v3899_v0  ;;  %3499 = vmatprep.subr.bf16.mxu1 %v3835_v54  ;;  %v3873_v54 = vld [vmem:[%s4510_s3] ss:$8 sps:$4 sm:$0xff]  }
 0x460   : > { %3626 = vmatmul.mubr.msk.bf16.vlgmr.msra.gmra.mxu0 %vm1378_vm9, %v3200_v56  ;;  %3632 = vmatmul.mubr.msk.bf16.vlgmr.msra.gmra.mxu1 %vm1378_vm9, %v3202_v32 }
 0x461   : > { %3636 = vmatpush3.bf16.msra.mxu0 %v1387_v55  ;;  %3637 = vmatprep.mubr.msk.bf16.mxu0 %vm3900_vm0, %v3899_v0 }
 0x462   : > { %3500 = vmatpush3.bf16.msra.mxu1 %v3836_v57  ;;  %3521 = vmatprep.subr.bf16.mxu0 %v3840_v58 }
 0x463   : > { %3501 = vmatprep.subr.bf16.mxu1 %v3837_v59 }
 0x466   : > { %3502 = vmatpush3.bf16.msra.mxu1 %v3838_v60 }
 0x467   : > { %3503 = vmatprep.subr.bf16.mxu1 %v3839_v61 }
 0x468   : > { %3638 = vmatmul.mubr.msk.bf16.vlgmr.msra.gmra.mxu0 %vm1378_vm9, %v3204_v62 }
 0x469   : > { %3522 = vmatpush3.bf16.msra.mxu0 %v3842_v63 }
 0x46a   : > { %3504 = vmatpush3.bf16.msra.mxu1 %v3841_v1  ;;  %3523 = vmatprep.subr.bf16.mxu0 %v3844_v2 }
 0x46b   : > { %3505 = vmatprep.subr.bf16.mxu1 %v3843_v3 }
 0x46d   : > { %3524 = vmatpush3.bf16.msra.mxu0 %v3846_v4 }
 0x46e   : > { %3506 = vmatpush3.bf16.msra.mxu1 %v3845_v5  ;;  %3525 = vmatprep.subr.bf16.mxu0 %v3848_v6  ;;  %v1959_v5 = vld [vmem:[%s4511_s4] sm:$0x1f] }
 0x46f   : > { %3507 = vmatprep.subr.bf16.mxu1 %v3847_v7 }
 0x471   : > { %3526 = vmatpush3.bf16.msra.mxu0 %v3850_v8 }
 0x472   : > { %3508 = vmatpush3.bf16.msra.mxu1 %v3849_v9  ;;  %3527 = vmatprep.subr.bf16.mxu0 %v3852_v11  ;;  %v3874_v9 = vld [vmem:[%s4510_s3 + $0x50] ss:$0 sps:$4 sm:$0xff]  }
 0x473   : > { %3509 = vmatprep.subr.bf16.mxu1 %v3851_v10  ;;  %v3313_v10 = vld [vmem:[%s4511_s4 + $0x18] sm:$0x1f]  ;;  %v3316_v11 = vld [vmem:[%s4511_s4 + $0x30] sm:$0x1f] }
 0x475   : > { %3528 = vmatpush3.bf16.msra.mxu0 %v3854_v13 }
 0x476   : > { %3510 = vmatpush3.bf16.msra.mxu1 %v3853_v12  ;;  %3529 = vmatprep.subr.bf16.mxu0 %v3856_v15  ;;  %v3875_v15 = vld [vmem:[%s4510_s3 + $0x40] ss:$8 sps:$4 sm:$0xff]  }
 0x477   : > { %3511 = vmatprep.subr.bf16.mxu1 %v3855_v14  ;;  %v2232_v14 = vsel %vm1383_vm8, %v3874_v9, 0  ;;  %v3361_v9 = vld [vmem:[%s4511_s4 + $0xa0] sm:$0x1] }
 0x479   : > { %3530 = vmatpush3.bf16.msra.mxu0 %v3858_v17 }
 0x47a   : > { %3512 = vmatpush3.bf16.msra.mxu1 %v3857_v16  ;;  %3531 = vmatprep.subr.bf16.mxu0 %v3860_v19  ;;  %v3876_v16 = vld [vmem:[%s4510_s3 + $0x30] ss:$8 sps:$4 sm:$0xff]   ;;  %v3312_v19 = vld [vmem:[%s4512_s5] ss:$0 sm:$0xff] }
 0x47b   : > { %3513 = vmatprep.subr.bf16.mxu1 %v3859_v18 }
 0x47d   : > { %3532 = vmatpush3.bf16.msra.mxu0 %v3862_v21 }
 0x47e   : > { %3514 = vmatpush3.bf16.msra.mxu1 %v3861_v20  ;;  %3533 = vmatprep.subr.bf16.mxu0 %v3865_v22 }
 0x47f   : > { %3641 = vmatprep.subr.bf16.mxu1 %v3899_v0 }
 0x481   : > { %3534 = vmatpush3.bf16.msra.mxu0 %v3866_v23 }
 0x482   : > { %3535 = vmatprep.subr.bf16.mxu0 %v3867_v24 }
 0x485   : > { %3536 = vmatpush3.bf16.msra.mxu0 %v3868_v25 }
 0x486   : > { %3651 = vmatprep.subr.mxu0 %v3899_v0 }
 0x520   : > { %v1423_v26 = vpop.f32.mrf.mxu0  ;;  %v1471_v27 = vpop.f32.mrf.mxu1 }
 0x521   : > { %v1429_v28 = vpack.c.bf16 %v1423_v26, %v1423_v26  ;;  %v1477_v29 = vpack.c.bf16 %v1471_v27, %v1471_v27 }
 0x522   : > { %v3627_v30 = vpop.f32.mrf.mxu0  ;;  %v3633_v31 = vpop.f32.mrf.mxu1 }
 0x523   : > { %1431 = vst.msk [vmem:[#allocation2] sm:$0x3] %vm1430_vm10, %v1429_v28  ;;  %1478 = vst.msk [vmem:[#allocation2 + $0x4] sm:$0x3] %vm1430_vm10, %v1477_v29  ;;  %v3329_v29 = vld [vmem:[%s4511_s4 + $0x48] sm:$0xff] }
 0x524   : > { %v1426_v33 = vpop.f32.mrf.mxu0  ;;  %v1474_v34 = vpop.f32.mrf.mxu1  ;;  %v3330_v31 = vld [vmem:[%s4511_s4 + $0x50] sm:$0x1] }
 0x525   : > { %v3335_v34 = vld [vmem:[%s4511_s4 + $0x60] sm:$0xff] }
 0x526   : > { %v3628_v35 = vpop.f32.mrf.mxu0  ;;  %v3634_v36 = vpop.f32.mrf.mxu1 }
 0x528   : > { %v1518_v37 = vpop.f32.mrf.mxu0 }
 0x529   : > { %v1524_v38 = vpack.c.bf16 %v1518_v37, %v1518_v37 }
 0x52a   : > { %v3639_v39 = vpop.f32.mrf.mxu0  ;;  %v1526_v40 = vld [vmem:[#allocation2] sm:$0x33] }
 0x52b   : > { %1525 = vst.msk [vmem:[#allocation2 + $0x8] sm:$0x3] %vm1430_vm10, %v1524_v38  ;;  %v3270_v41 = vcombine.low %v1526_v40, %v1526_v40  ;;  %v3271_v42 = vcombine.high %v1526_v40, %v1526_v40  ;;  %v3336_v38 = vld [vmem:[%s4511_s4 + $0x68] sm:$0x1]  ;;  %v3340_v39 = vld [vmem:[%s4511_s4 + $0x78] sm:$0xff] }
 0x52c   : > { %v1521_v43 = vpop.f32.mrf.mxu0 }
 0x52d   : > { %1831 = vmatprep.mubr.bf16.mxu1 %v3271_v42  ;;  %v3349_v42 = vld [vmem:[%s4510_s3 + $0x80] sm:$0x33] }
 0x52e   : > { %v3640_v44 = vpop.f32.mrf.mxu0  ;;  %1832 = vmatmul.mubr.bf16.vlgmr.msra.gmra.mxu1 %v3270_v41  ;;  %v3341_v41 = vld [vmem:[%s4511_s4 + $0x80] sm:$0x1]  ;;  %v3355_v43 = vcombine.high %v3349_v42, %v3349_v42 }
 0x52f   : > { %3647 = vmatprep.mubr.msk.bf16.mxu1 %vm3900_vm0, %v3899_v0  ;;  %3642 = vmatpush3.bf16.msra.mxu1 %v3871_v48  ;;  %v3354_v44 = vcombine.low %v3349_v42, %v3349_v42  ;;  %v3884_v48 = vld [vmem:[%s4510_s3 + $0x64] ss:$8 sps:$4 sm:$0xff]  }
 0x530   : > { %3643 = vmatprep.subr.bf16.mxu1 %v3899_v0 }
 0x532   : > { %v1527_v45 = vld [vmem:[#allocation2 + $0x8] sm:$0x33] }
 0x533   : > { %v3272_v46 = vcombine.low %v1527_v45, %v1527_v45  ;;  %v3273_v47 = vcombine.high %v1527_v45, %v1527_v45  ;;  %3644 = vmatpush3.bf16.msra.mxu1 %v3872_v49  ;;  %v2593_v45 = vsel %vm2591_vm1, %v3354_v44, 0  ;;  %v3882_v49 = vld [vmem:[%s4510_s3 + $0x60] ss:$8 sps:$4 sm:$0xff]  }
 0x534   : > { %3645 = vmatprep.subr.bf16.mxu1 %v3899_v0 }
 0x535   : > { %1871 = vmatprep.mubr.bf16.mxu0 %v3273_v47  ;;  %v3879_v47 = vld [vmem:[%s4510_s3 + $0x70] ss:$8 sps:$4 sm:$0xff]  }
 0x536   : > { %1872 = vmatmul.mubr.bf16.vlgmr.msra.gmra.mxu0 %v3272_v46  ;;  %v3881_v46 = vld [vmem:[%s4510_s3 + $0x74] ss:$8 sps:$4 sm:$0xff]  }
 0x537   : > { %3653 = vmatprep.mubr.msk.f32.mxu0 %vm3900_vm0, %v3899_v0  ;;  %3646 = vmatpush3.bf16.msra.mxu1 %v3873_v54 }
 0x538   : > { %3661 = vmatprep.subr.mxu1 %v3899_v0 }
 0x5ee   : > { %v3515_v50 = vpop.f32.mrf.mxu1 }
 0x5f0   : > { %v3516_v51 = vpop.f32.mrf.mxu1 }
 0x5f1   : > { %v3517_v32 = vadd.f32 %v3516_v51, %v3515_v50  ;;  %v3910_v50 = vmov 0  }
 0x5f2   : > { %v3518_v52 = vpop.f32.mrf.mxu1 }
 0x5f3   : > { %v3334_v52 = vld [vmem:[%s4512_s5 + $0x1] ss:$0 sm:$0xff] }
 0x5f4   : > { %v3519_v53 = vpop.f32.mrf.mxu1 }
 0x5f6   : > { %v3537_v55 = vpop.f32.mrf.mxu0 }
 0x5f8   : > { %v3538_v56 = vpop.f32.mrf.mxu0 }
 0x5f9   : > { %v3539_v57 = vadd.f32 %v3538_v56, %v3537_v55 }
 0x5fa   : > { %v3540_v58 = vpop.f32.mrf.mxu0 }
 0x5fb   : > { %v1874_v59 = vadd.f32 %v3539_v57, %v3517_v32 }
 0x5fc   : > { %v3541_v60 = vpop.f32.mrf.mxu0 }
 0x5fd   : > { %v1879_v61 = vmax.f32 %v1874_v59, 0.0 }
 0x5ff   : > { %v1881_v62 = vrot.slane %v1879_v61, 1 }
 0x601   : > { %v1883_v63 = vmax.f32 %v1879_v61, %v1881_v62 }
 0x603   : > { %1885 = vrot.lane.b32.xlu1 %v1883_v63, %s3905_s25  ;;  %s3912_s25 = smov 26  }
 0x675   : > { %v1886_v1 = vpop.permute.xlu1 %1885 }
 0x676   : > { %v1888_v2 = vmax.f32 %v1883_v63, %v1886_v1 }
 0x678   : > { %v1889_v3 = vpack.c.bf16 %v1888_v2, %v1888_v2 }
 0x67a   : > { %3648 = vmatmul.mubr.msk.bf16.vlgmr.msra.gmra.mxu1 %vm1914_vm11, %v1889_v3 }
 0x67b   : > { %3663 = vmatprep.mubr.msk.f32.mxu1 %vm3900_vm0, %v3899_v0 }
 0x73a   : > { %v1952_v4 = vpop.f32.mrf.mxu1 }
 0x73b   : > { %2126 = vrot.lane.b32.xlu0 %v1952_v4, %s3906_s28  ;;  %2046 = vrot.lane.b32.xlu1 %v1952_v4, %s3907_s29 }
 0x73c   : > { %3652 = vmatpush3.msk.msra.mxu0 %vm1382_vm7, %v1952_v4  ;;  %v3649_v6 = vpop.f32.mrf.mxu1 }
 0x73d   : > { %3654 = vmatmul.mubr.msk.f32.vlgmr.msra.gmra.mxu0 %vm1960_vm12, %v1959_v5  ;;  %3656 = vmatprep.subr.mxu0 %v3899_v0  ;;  %v3359_v6 = vld [vmem:[%s4511_s4 + $0x90] sm:$0xff] }
 0x73e   : > { %v1955_v7 = vpop.f32.mrf.mxu1  ;;  %3658 = vmatprep.mubr.msk.f32.mxu0 %vm3900_vm0, %v3899_v0 }
 0x740   : > { %v3650_v8 = vpop.f32.mrf.mxu1 }
 0x741   : > { %v3360_v8 = vld [vmem:[%s4511_s4 + $0x98] sm:$0xff] }
 0x7ad   : > { %v2127_v12 = vpop.permute.xlu0 %2126  ;;  %v2047_v13 = vpop.permute.xlu1 %2046 }
 0x7ae   : > { %3657 = vmatpush3.msk.msra.mxu0 %vm1382_vm7, %v2047_v13  ;;  %3662 = vmatpush3.msk.msra.mxu1 %vm1382_vm7, %v2127_v12  ;;  %v3367_v12 = vld [vmem:[%s4511_s4 + $0xa8] sm:$0xff] }
 0x7af   : > { %3659 = vmatmul.mubr.msk.f32.vlgmr.msra.gmra.mxu0 %vm1960_vm12, %v3313_v10  ;;  %3664 = vmatmul.mubr.msk.f32.vlgmr.msra.gmra.mxu1 %vm1960_vm12, %v3316_v11 }
 0x7b0   : > { %3666 = vmatprep.subr.bf16.mxu0 %v3899_v0  ;;  %3672 = vmatprep.mubr.msk.bf16.mxu0 %vm3900_vm0, %v3899_v0 }
 0x7b1   : > { %3667 = vmatpush3.bf16.msra.mxu0 %v2232_v14  ;;  %3678 = vmatprep.mubr.msk.f32.mxu1 %vm2279_vm14, %v3329_v29 }
 0x7b2   : > { %3668 = vmatprep.subr.bf16.mxu0 %v3899_v0 }
 0x7b5   : > { %3669 = vmatpush3.bf16.msra.mxu0 %v3875_v15 }
 0x7b6   : > { %3670 = vmatprep.subr.bf16.mxu0 %v3899_v0 }
 0x7b9   : > { %3671 = vmatpush3.bf16.msra.mxu0 %v3876_v16  ;;  %v3368_v16 = vld [vmem:[%s4511_s4 + $0xb0] sm:$0xff] }
 0x7ba   : > { %3356 = vmatprep.subr.msk.bf16.mxu0 %vm2591_vm1, %v3355_v43 }
 0x7fd   : > { %v2033_v17 = vpop.f32.mrf.mxu0 }
 0x7fe   : > { %v2043_v20 = vadd.f32 %v3312_v19, %v2033_v17  ;;  %v3374_v19 = vld [vmem:[%s4511_s4 + $0xc0] sm:$0xff] }
 0x7ff   : > { %v3655_v18 = vpop.f32.mrf.mxu0 }
 0x86f   : > { %v2119_v21 = vpop.f32.mrf.mxu0  ;;  %v2199_v22 = vpop.f32.mrf.mxu1 }
 0x870   : > { %v2123_v23 = vadd.f32 %v2119_v21, %v2043_v20  ;;  %v3369_v21 = vld [vmem:[%s4511_s4 + $0xb8] sm:$0x1] }
 0x871   : > { %v3660_v24 = vpop.f32.mrf.mxu0  ;;  %v3665_v25 = vpop.f32.mrf.mxu1 }
 0x872   : > { %v2203_v26 = vadd.f32 %v2199_v22, %v2123_v23  ;;  %v3375_v22 = vld [vmem:[%s4511_s4 + $0xc8] sm:$0xff]  ;;  %v3376_v23 = vld [vmem:[%s4511_s4 + $0xd0] sm:$0x1] }
 0x874   : > { %v2204_v27 = vmax.f32 %v2203_v26, 0.0 }
 0x876   : > { %v2205_v28 = vpack.c.bf16 %v2204_v27, %v2204_v27 }
 0x878   : > { %3673 = vmatmul.mubr.msk.bf16.vlgmr.msra.gmra.mxu0 %vm2227_vm13, %v2205_v28 }
 0x879   : > { %2609 = vmatpush1.bf16.msra.mxu0 %v2593_v45  ;;  %2630 = vmatprep.mubr.bf16.mxu0 %v3910_v50 }
 0x87a   : > { %2610 = vmatprep.subr.bf16.mxu0 %v3881_v46 }
 0x87d   : > { %2611 = vmatpush1.bf16.msra.mxu0 %v3879_v47 }
 0x87e   : > { %2612 = vmatprep.subr.bf16.mxu0 %v3884_v48 }
 0x881   : > { %2613 = vmatpush1.bf16.msra.mxu0 %v3882_v49 }
 0x882   : > { %3717 = vmatprep.subr.mxu0 %v3899_v0 }
 0x938   : > { %v2268_v30 = vpop.f32.mrf.mxu0 }
 0x939   : > { %2466 = vrot.lane.b32.xlu0 %v2268_v30, %s3908_s20  ;;  %2376 = vrot.lane.b32.xlu1 %v2268_v30, %s3909_s23 }
 0x93a   : > { %3676 = vmatprep.subr.msk.mxu1 %vm2286_vm15, %v2268_v30  ;;  %v3674_v33 = vpop.f32.mrf.mxu0 }
 0x93b   : > { %3677 = vmatpush3.msk.msra.mxu1 %vm2286_vm15, %v2268_v30 }
 0x93c   : > { %v2271_v35 = vpop.f32.mrf.mxu0  ;;  %3679 = vmatmul.mubr.msk.f32.vlgmr.msra.gmra.mxu1 %vm2279_vm14, %v3330_v31  ;;  %v3366_v31 = vld [vmem:[%s4512_s5 + $0x2] ss:$0 sm:$0xff] }
 0x93d   : > { %3683 = vmatprep.mubr.msk.f32.mxu1 %vm2279_vm14, %v3335_v34 }
 0x93e   : > { %v3675_v36 = vpop.f32.mrf.mxu0 }
 0x9ab   : > { %v2377_v37 = vpop.permute.xlu1 %2376  ;;  %v2467_v40 = vpop.permute.xlu0 %2466 }
 0x9ac   : > { %3681 = vmatprep.subr.msk.mxu1 %vm2286_vm15, %v2377_v37 }
 0x9ad   : > { %3682 = vmatpush3.msk.msra.mxu1 %vm2286_vm15, %v2377_v37 }
 0x9ae   : > { %3684 = vmatmul.mubr.msk.f32.vlgmr.msra.gmra.mxu1 %vm2279_vm14, %v3336_v38  ;;  %3686 = vmatprep.subr.msk.mxu1 %vm2286_vm15, %v2467_v40 }
 0x9af   : > { %3687 = vmatpush3.msk.msra.mxu1 %vm2286_vm15, %v2467_v40  ;;  %3688 = vmatprep.mubr.msk.f32.mxu1 %vm2279_vm14, %v3340_v39 }
 0x9b0   : > { %3691 = vmatprep.subr.mxu1 %v3899_v0 }
 0x9b2   : > { %3689 = vmatmul.mubr.msk.f32.vlgmr.msra.gmra.mxu1 %vm2279_vm14, %v3341_v41 }
 0x9b3   : > { %3695 = vmatprep.mubr.msk.f32.mxu1 %vm3900_vm0, %v3899_v0 }
 0x9fc   : > { %v3680_v51 = vpop.f32.mrf.mxu1 }
 0x9fd   : > { %v2372_v55 = vadd.f32 %v3680_v51, %v3334_v52 }
 0x9fe   : > { %v2356_v53 = vpop.f32.mrf.mxu1 }
 0x9ff   : > { %v2371_v32 = vadd.f32 %v3334_v52, %v2356_v53 }
 0xa6e   : > { %v3685_v54 = vpop.f32.mrf.mxu1 }
 0xa6f   : > { %v2462_v57 = vadd.f32 %v3685_v54, %v2372_v55 }
 0xa70   : > { %v2452_v56 = vpop.f32.mrf.mxu1 }
 0xa71   : > { %v2461_v59 = vadd.f32 %v2452_v56, %v2371_v32 }
 0xa72   : > { %v3690_v58 = vpop.f32.mrf.mxu1 }
 0xa73   : > { %v2552_v60 = vadd.f32 %v3690_v58, %v2462_v57 }
 0xa74   : > { %v2542_v61 = vpop.f32.mrf.mxu1 }
 0xa75   : > { %v2551_v62 = vadd.f32 %v2542_v61, %v2461_v59  ;;  %v2554_v63 = vmax.f32 %v2552_v60, 0.0 }
 0xa77   : > { %v2553_v1 = vmax.f32 %v2551_v62, 0.0 }
 0xa79   : > { %v2555_v2 = vpack.c.bf16 %v2554_v63, %v2553_v1 }
 0xa7b   : > { %3357 = vmatmul.mubr.msk.bf16.vlgmr.msra.gmra.mxu0 %vm2587_vm2, %v2555_v2 }
 0xa7c   : > { %3721 = vmatprep.mubr.msk.f32.mxu0 %vm3900_vm0, %v3899_v0 }
 0xb3b   : > { %v2632_v3 = vpop.f32.mrf.mxu0 }
 0xb3c   : > { %2755 = vrot.lane.b32.xlu0 %v2632_v3, %s3911_s24 }
 0xb3d   : > { %v2634_v4 = vpop.f32.mrf.mxu0 }
 0xb3f   : > { %v2636_v5 = vpop.f32.mrf.mxu0 }
 0xb40   : > { %2864 = vrot.lane.b32.xlu0 %v2636_v5, %s3912_s25  ;;  %2757 = vrot.lane.b32.xlu1 %v2636_v5, %s3911_s24  ;;  %s3730_s24 = smul.u32 24, %s4515_s22 }
 0xb41   : > { %3692 = vmatpush3.msk.msra.mxu1 %vm2657_vm3, %v2636_v5  ;;  %v2638_v7 = vpop.f32.mrf.mxu0 }
 0xb42   : > { %3693 = vmatprep.subr.mxu1 %v3899_v0  ;;  %s251_s27 = scalar_lea.vmem %s4513_s6, %s3730_s24 }
 0xb43   : > { %3694 = vmatpush3.msra.mxu1 %v2632_v3 }
 0xb44   : > { %2862 = vrot.lane.b32.xlu0 %v2634_v4, %s3912_s25  ;;  %2866 = vrot.lane.b32.xlu1 %v2638_v7, %s3912_s25 }
 0xb45   : > { %3696 = vmatmul.mubr.msk.f32.vlgmr.msra.gmra.mxu1 %vm2647_vm4, %v3359_v6  ;;  %3704 = vmatprep.subr.mxu1 %v3899_v0 }
 0xb46   : > { %3698 = vmatprep.mubr.msk.f32.mxu1 %vm3900_vm0, %v3899_v0 }
 0xb48   : > { %2860 = vrot.lane.b32.xlu1 %v2632_v3, %s3912_s25 }
 0xb49   : > { %3699 = vmatmul.mubr.msk.f32.gmra.mxu1 %vm2647_vm4, %v3360_v8 }
 0xb4a   : > { %3701 = vmatprep.mubr.msk.f32.mxu1 %vm3900_vm0, %v3899_v0 }
 0xb4d   : > { %3702 = vmatmul.mubr.msk.f32.gmra.mxu1 %vm2647_vm4, %v3361_v9 }
 0xb4e   : > { %3708 = vmatprep.mubr.msk.f32.mxu1 %vm3900_vm0, %v3899_v0 }
 0xbae   : > { %v2756_v10 = vpop.permute.xlu0 %2755 }
 0xbb2   : > { %v2758_v11 = vpop.permute.xlu1 %2757  ;;  %v2865_v13 = vpop.permute.xlu0 %2864 }
 0xbb3   : > { %3705 = vmatpush3.msk.msra.mxu1 %vm2657_vm3, %v2758_v11 }
 0xbb4   : > { %3706 = vmatprep.subr.mxu1 %v3899_v0 }
 0xbb5   : > { %3707 = vmatpush3.msra.mxu1 %v2756_v10 }
 0xbb6   : > { %3709 = vmatmul.mubr.msk.f32.vlgmr.msra.gmra.mxu1 %vm2647_vm4, %v3367_v12  ;;  %v2867_v14 = vpop.permute.xlu1 %2866  ;;  %v2863_v17 = vpop.permute.xlu0 %2862 }
 0xbb7   : > { %v2870_v15 = vsel %vm2868_vm5, %v2865_v13, %v2867_v14  ;;  %3711 = vmatprep.mubr.msk.f32.mxu1 %vm3900_vm0, %v3899_v0 }
 0xbb8   : > { %3718 = vmatpush3.msk.msra.mxu0 %vm2657_vm3, %v2870_v15 }
 0xbb9   : > { %3719 = vmatprep.subr.mxu0 %v3899_v0 }
 0xbba   : > { %3712 = vmatmul.mubr.msk.f32.gmra.mxu1 %vm2647_vm4, %v3368_v16  ;;  %v2861_v18 = vpop.permute.xlu1 %2860 }
 0xbbb   : > { %v2869_v20 = vsel %vm2868_vm5, %v2861_v18, %v2863_v17  ;;  %3714 = vmatprep.mubr.msk.f32.mxu1 %vm3900_vm0, %v3899_v0 }
 0xbbc   : > { %3720 = vmatpush3.msra.mxu0 %v2869_v20 }
 0xbbd   : > { %3722 = vmatmul.mubr.msk.f32.vlgmr.msra.gmra.mxu0 %vm2647_vm4, %v3374_v19 }
 0xbbe   : > { %3715 = vmatmul.mubr.msk.f32.gmra.mxu1 %vm2647_vm4, %v3369_v21  ;;  %3724 = vmatprep.mubr.msk.f32.mxu0 %vm3900_vm0, %v3899_v0 }
 0xbc1   : > { %3725 = vmatmul.mubr.msk.f32.gmra.mxu0 %vm2647_vm4, %v3375_v22 }
 0xbc2   : > { %3727 = vmatprep.mubr.msk.f32.mxu0 %vm3900_vm0, %v3899_v0  ;;  %vm2972_vm0 = vcmask 416768  }
 0xbc5   : > { %3728 = vmatmul.mubr.msk.f32.gmra.mxu0 %vm2647_vm4, %v3376_v23 }
 0xc05   : > { %v2727_v24 = vpop.f32.mrf.mxu1 }
 0xc06   : > { %v2747_v34 = vadd.f32 %v3366_v31, %v2727_v24 }
 0xc07   : > { %v3697_v25 = vpop.f32.mrf.mxu1 }
 0xc09   : > { %v2732_v26 = vpop.f32.mrf.mxu1 }
 0xc0a   : > { %v2748_v38 = vadd.f32 %v3366_v31, %v2732_v26 }
 0xc0b   : > { %v3700_v27 = vpop.f32.mrf.mxu1 }
 0xc0d   : > { %v2737_v28 = vpop.f32.mrf.mxu1 }
 0xc0e   : > { %v2749_v46 = vadd.f32 %v3366_v31, %v2737_v28 }
 0xc0f   : > { %v3703_v29 = vpop.f32.mrf.mxu1 }
 0xc76   : > { %v2837_v30 = vpop.f32.mrf.mxu1 }
 0xc77   : > { %v2851_v35 = vadd.f32 %v2837_v30, %v2747_v34 }
 0xc78   : > { %v3710_v33 = vpop.f32.mrf.mxu1 }
 0xc7a   : > { %v2842_v0 = vpop.f32.mrf.mxu1 }
 0xc7b   : > { %v2852_v42 = vadd.f32 %v2842_v0, %v2748_v38 }
 0xc7c   : > { %v3713_v36 = vpop.f32.mrf.mxu1 }
 0xc7d   : > { %v2949_v37 = vpop.f32.mrf.mxu0 }
 0xc7e   : > { %v2963_v39 = vadd.f32 %v2949_v37, %v2851_v35  ;;  %v2847_v40 = vpop.f32.mrf.mxu1 }
 0xc7f   : > { %v3723_v41 = vpop.f32.mrf.mxu0  ;;  %v2853_v49 = vadd.f32 %v2847_v40, %v2749_v46 }
 0xc80   : > { %v2966_v43 = vmax.f32 %v2963_v39, 0.0  ;;  %v3716_v44 = vpop.f32.mrf.mxu1 }
 0xc81   : > { %v2954_v45 = vpop.f32.mrf.mxu0 }
 0xc82   : > { %3885 = vtanh.f32 %v2966_v43  ;;  %v2964_v47 = vadd.f32 %v2954_v45, %v2852_v42 }
 0xc83   : > { %v3726_v48 = vpop.f32.mrf.mxu0 }
 0xc84   : > { %v2967_v50 = vmax.f32 %v2964_v47, 0.0 }
 0xc85   : > { %v2959_v51 = vpop.f32.mrf.mxu0 }
 0xc86   : > { %3887 = vtanh.f32 %v2967_v50  ;;  %v2965_v52 = vadd.f32 %v2959_v51, %v2853_v49 }
 0xc87   : > { %v3729_v53 = vpop.f32.mrf.mxu0 }
 0xc88   : > { %v2968_v54 = vmax.f32 %v2965_v52, 0.0 }
 0xc8a   : > { %3889 = vtanh.f32 %v2968_v54 }
 0xc8f   : > { %v3886_v55 = vpop.eup %3885 }
 0xc90   : > { %2973 = vst.msk [vmem:[%s251_s27] sm:$0xff] %vm2972_vm0, %v3886_v55 }
 0xc93   : > { %v3888_v56 = vpop.eup %3887 }
 0xc94   : > { %2974 = vst.msk [vmem:[%s251_s27 + $0x8] sm:$0xff] %vm2972_vm0, %v3888_v56 }
 0xc97   : > { %v3890_v32 = vpop.eup %3889 }
 0xc98   : > { %2976 = vst.msk [vmem:[%s251_s27 + $0x10] sm:$0x1] %vm2975_vm6, %v3890_v32 }
 0xc99 PF: > { %s16_s21 = sadd.s32 1, %s3897_s21  }
 0xc9a   : > { %p13_p4 = scmp.ge.s32.totalorder %s16_s21, 4  }
 0xc9c   :  { %15 = sbr.rel (!%p13_p4) target bundleno = 1 (0x1), region = 96 }

</bundles_post_ra>
